<compile_context>
chip_gen: v7x
topology: tpu7x:2x2x1
jax: 0.10.0
libtpu: 0.0.40
codegen_flags: <defaults>
</compile_context>

<pallas_src>
import functools

import jax
import jax.numpy as jnp
from jax import lax
from jax.experimental import pallas as pl
from jax.experimental.pallas import tpu as pltpu


# Explicit scoped-VMEM budget: above v5e's 16 MiB / v6e-v7x's 32 MiB defaults,
# below every generation's physical VMEM (64 MiB on v7x).
DEFAULT_VMEM_LIMIT = 48 * 1024 * 1024


def _layernorm(x, gamma, beta, eps=1e-6):
    mean = jnp.mean(x, axis=-1, keepdims=True)
    var = jnp.mean((x - mean) ** 2, axis=-1, keepdims=True)
    return (x - mean) * lax.rsqrt(var + eps) * gamma + beta


def _fit_tile(requested, total, quantum=128):
    """Largest multiple of `quantum` <= requested that divides `total` (else `total`)."""
    t = min(requested, total)
    t -= t % quantum
    while t >= quantum and total % t != 0:
        t -= quantum
    return t if (t >= quantum and total % t == 0) else total


def _resident_spec(shape, single_buffer):
    """BlockSpec for a block whose index is identical for every grid step (weights)."""
    index_map = lambda *_: (0,) * len(shape)
    if single_buffer:
        # Constant blocks are never re-fetched; single-buffering them frees VMEM.
        return pl.BlockSpec(shape, index_map, pipeline_mode=pl.Buffered(1))
    return pl.BlockSpec(shape, index_map)


def _compiler_params(dimension_semantics, vmem_limit_bytes):
    kwargs = dict(dimension_semantics=dimension_semantics)
    if vmem_limit_bytes is not None:
        kwargs["vmem_limit_bytes"] = int(vmem_limit_bytes)
    return pltpu.CompilerParams(**kwargs)


# ---------------------------------------------------------------------------
# Kernel 1: fused Q/K/V projection (one pass over T, hoisted out of the flash loop).
# ---------------------------------------------------------------------------
def _qkv_proj_kernel(x_ref, wqkv_ref, q_ref, k_ref, v_ref):
    dk = q_ref.shape[-1]
    x = x_ref[...].astype(jnp.bfloat16)
    qkv = jnp.dot(x, wqkv_ref[...], preferred_element_type=jnp.float32)
    # Slices are lane-tile aligned when dk % 128 == 0 (CA-SUM's 1024, demo 128).
    q_ref[...] = qkv[:, :dk].astype(jnp.bfloat16)          # already 1/sqrt(dk) scaled
    k_ref[...] = qkv[:, dk:2 * dk].astype(jnp.bfloat16)
    v_ref[...] = qkv[:, 2 * dk:].astype(jnp.bfloat16)


# ---------------------------------------------------------------------------
# Kernel 2: flash self-attention, grid (T/tq, T/tk), online softmax.
# ---------------------------------------------------------------------------
def _flash_attn_kernel(q_ref, k_ref, v_ref, o_ref, m_sc, l_sc, acc_sc):
    ki = pl.program_id(1)

    @pl.when(ki == 0)
    def _init():
        m_sc[...] = jnp.full_like(m_sc, -jnp.inf)
        l_sc[...] = jnp.zeros_like(l_sc)
        acc_sc[...] = jnp.zeros_like(acc_sc)

    # scores [tq, tk]: contract the feature dims of q and k (NT form, same as the
    # reference Pallas flash kernels; no K transpose materialized per step).
    s = lax.dot_general(q_ref[...], k_ref[...],
                        dimension_numbers=(((1,), (1,)), ((), ())),
                        preferred_element_type=jnp.float32)
    m_prev = m_sc[...]
    m_new = jnp.maximum(m_prev, jnp.max(s, axis=-1, keepdims=True))
    alpha = jnp.exp(m_prev - m_new)
    p = jnp.exp(s - m_new)
    l_sc[...] = alpha * l_sc[...] + jnp.sum(p, axis=-1, keepdims=True)
    acc_sc[...] = alpha * acc_sc[...] + jnp.dot(
        p.astype(jnp.bfloat16), v_ref[...], preferred_element_type=jnp.float32)
    m_sc[...] = m_new

    @pl.when(ki == pl.num_programs(1) - 1)
    def _finalize():
        inv_l = pl.reciprocal(l_sc[...], approx=True)       # EUP slot, ~free
        o_ref[...] = (acc_sc[...] * inv_l).astype(o_ref.dtype)


# ---------------------------------------------------------------------------
# Kernel 3: summarizer head (Wo proj + residual + LN + MLP + LN + logits).
# ---------------------------------------------------------------------------
def _head_kernel(x_ref, attn_ref, wo_ref, bo_ref, w1_ref, b1_ref, w2_ref, b2_ref,
                 gy_ref, by_ref, gl_ref, bl_ref, out_ref):
    proj = jnp.dot(attn_ref[...], wo_ref[...],
                   preferred_element_type=jnp.float32) + bo_ref[...]
    y = x_ref[...] + proj                                   # residual (f32)
    # nn.Dropout(p=0.5) -> identity in eval mode.
    y = _layernorm(y, gy_ref[...], by_ref[...], eps=1e-6)   # norm_y
    h = jnp.dot(y.astype(jnp.bfloat16), w1_ref[...],
                preferred_element_type=jnp.float32) + b1_ref[...]
    h = jnp.maximum(h, 0.0)                                 # ReLU
    # nn.Dropout(p=0.5) -> identity in eval mode.
    h = _layernorm(h, gl_ref[...], bl_ref[...], eps=1e-6)   # norm_linear
    # Lane-dense logits row: [1, th] = w2[1, D] . h[th, D]^T  (unmasked stores).
    logits = lax.dot_general(w2_ref[...], h.astype(jnp.bfloat16),
                             dimension_numbers=(((1,), (1,)), ((), ())),
                             preferred_element_type=jnp.float32) + b2_ref[...]
    out_ref[...] = jax.nn.sigmoid(logits)                   # [1, th]


# ---------------------------------------------------------------------------
# One-time parameter preparation (hoisted out of the forward pass).
# ---------------------------------------------------------------------------
def prepare_params(params):
    """Fuse Wq/Wk/Wv, fold the 1/sqrt(dk) scale into Wq, cast matmul weights to bf16."""
    if "wqkv" in params:
        return params
    dk = params["wk"].shape[1]
    scale = 1.0 / jnp.sqrt(jnp.float32(dk))
    wqkv = jnp.concatenate([params["wq"] * scale, params["wk"], params["wv"]], axis=1)
    f32, bf16 = jnp.float32, jnp.bfloat16
    return {
        "wqkv": wqkv.astype(bf16),                         # [D, 3*dk]
        "wo": params["wo"].astype(bf16),                   # [dk, D]
        "bo": params["bo"].reshape(1, -1).astype(f32),     # [1, D]
        "w1": params["w1"].astype(bf16),                   # [D, D]
        "b1": params["b1"].reshape(1, -1).astype(f32),
        "w2": params["w2"].reshape(1, -1).astype(bf16),    # [1, D] row layout
        "b2": params["b2"].reshape(1, 1).astype(f32),
        "gy": params["gy"].reshape(1, -1).astype(f32),
        "by": params["by"].reshape(1, -1).astype(f32),
        "gl": params["gl"].reshape(1, -1).astype(f32),
        "bl": params["bl"].reshape(1, -1).astype(f32),
    }


def _forward(x, p, tq, tk, tp, th, vmem_limit_bytes, single_buffer):
    T, D = x.shape
    dk = p["wo"].shape[0]                # attention feature size (output_size)
    bf16 = jnp.bfloat16
    x = x.astype(jnp.float32)

    tp = _fit_tile(tp, T)
    tk = _fit_tile(tk, T)
    th = _fit_tile(th, T)
    tq = _fit_tile(tq, T)
    if T // tq < 2:                      # give v7x's second TensorCore work
        tq = _fit_tile(max(tq // 2, 128), T)

    res = functools.partial(_resident_spec, single_buffer=single_buffer)

    # ---- 1) Q/K/V projection: one pass over T ------------------------------
    q, k, v = pl.pallas_call(
        _qkv_proj_kernel,
        out_shape=[jax.ShapeDtypeStruct((T, dk), bf16)] * 3,
        grid_spec=pltpu.PrefetchScalarGridSpec(
            num_scalar_prefetch=0,
            grid=(T // tp,),
            in_specs=[
                pl.BlockSpec((tp, D), lambda i: (i, 0)),   # frame features tile
                res((D, 3 * dk)),                          # fused Wq*scale | Wk | Wv
            ],
            out_specs=[pl.BlockSpec((tp, dk), lambda i: (i, 0))] * 3,
        ),
        compiler_params=_compiler_params(("parallel",), vmem_limit_bytes),
    )(x, p["wqkv"])

    # ---- 2) flash attention over (query tiles, key tiles) ------------------
    attn = pl.pallas_call(
        _flash_attn_kernel,
        out_shape=jax.ShapeDtypeStruct((T, dk), bf16),
        grid_spec=pltpu.PrefetchScalarGridSpec(
            num_scalar_prefetch=0,
            grid=(T // tq, T // tk),
            in_specs=[
                pl.BlockSpec((tq, dk), lambda qi, ki: (qi, 0)),   # Q tile (bf16, pre-scaled)
                pl.BlockSpec((tk, dk), lambda qi, ki: (ki, 0)),   # K tile (bf16)
                pl.BlockSpec((tk, dk), lambda qi, ki: (ki, 0)),   # V tile (bf16)
            ],
            out_specs=pl.BlockSpec((tq, dk), lambda qi, ki: (qi, 0)),
            scratch_shapes=[
                pltpu.VMEM((tq, 1), jnp.float32),    # running max
                pltpu.VMEM((tq, 1), jnp.float32),    # running denom
                pltpu.VMEM((tq, dk), jnp.float32),   # output accumulator
            ],
        ),
        compiler_params=_compiler_params(("parallel", "arbitrary"),
                                         vmem_limit_bytes),
    )(q, k, v)

    # ---- 3) head: Wo + residual + LN + Linear1/ReLU + LN + Linear2/sigmoid --
    scores_row = pl.pallas_call(
        _head_kernel,
        out_shape=jax.ShapeDtypeStruct((1, T), jnp.float32),
        grid_spec=pltpu.PrefetchScalarGridSpec(
            num_scalar_prefetch=0,
            grid=(T // th,),
            in_specs=[
                pl.BlockSpec((th, D), lambda i: (i, 0)),    # residual x (f32)
                pl.BlockSpec((th, dk), lambda i: (i, 0)),   # attention context (bf16)
                res((dk, D)),     # wo
                res((1, D)),      # bo
                res((D, D)),      # w1
                res((1, D)),      # b1
                res((1, D)),      # w2 (row layout -> lane-dense logits)
                res((1, 1)),      # b2
                res((1, D)),      # gamma_y
                res((1, D)),      # beta_y
                res((1, D)),      # gamma_linear
                res((1, D)),      # beta_linear
            ],
            out_specs=pl.BlockSpec((1, th), lambda i: (0, i)),
        ),
        compiler_params=_compiler_params(("parallel",), vmem_limit_bytes),
    )(x, attn, p["wo"], p["bo"], p["w1"], p["b1"], p["w2"], p["b2"],
      p["gy"], p["by"], p["gl"], p["bl"])

    # PyTorch linear_2 output layout is [T, 1]; kernel stores lane-dense [1, T].
    return scores_row.reshape(T, 1)


def summarizer_forward(x, params, *, tq=512, tk=512, tp=512, th=512,
                       vmem_limit_bytes=DEFAULT_VMEM_LIMIT,
                       single_buffer_weights=True):
    """Summarizer forward. `params` may be raw (init_params) or prepare_params output."""
    p = prepare_params(params)
    if single_buffer_weights:
        try:
            return _forward(x, p, tq, tk, tp, th, vmem_limit_bytes, True)
        except Exception:
            # pl.Buffered(1) not supported on this JAX/Mosaic build -> fall back
            # to default (double-buffered) constant blocks.
            pass
    return _forward(x, p, tq, tk, tp, th, vmem_limit_bytes, False)


def summarizer_reference(x, params):
    """Pure-JAX f32 reference of the same forward pass (raw params)."""
    x = x.astype(jnp.float32)
    dk = params["wk"].shape[1]
    q = x @ params["wq"]
    k = x @ params["wk"]
    v = x @ params["wv"]
    attn = jax.nn.softmax((q @ k.T) / jnp.sqrt(jnp.float32(dk)), axis=-1)
    wv_ = attn @ v @ params["wo"] + params["bo"]
    y = _layernorm(x + wv_, params["gy"], params["by"], eps=1e-6)
    y = jnp.maximum(y @ params["w1"] + params["b1"], 0.0)
    y = _layernorm(y, params["gl"], params["bl"], eps=1e-6)
    logits = y @ params["w2"].T + params["b2"]
    return jax.nn.sigmoid(logits)                  # [T, 1]


def init_params(key, input_size, output_size):
    ks = jax.random.split(key, 8)
    s_in = 1.0 / jnp.sqrt(jnp.float32(input_size))
    s_out = 1.0 / jnp.sqrt(jnp.float32(output_size))
    return {
        # attention (stored [in, out])
        "wq": jax.random.normal(ks[0], (input_size, output_size), jnp.float32) * s_in,
        "wk": jax.random.normal(ks[1], (input_size, output_size), jnp.float32) * s_in,
        "wv": jax.random.normal(ks[2], (input_size, output_size), jnp.float32) * s_in,
        "wo": jax.random.normal(ks[3], (output_size, input_size), jnp.float32) * s_out,
        "bo": jnp.zeros((1, input_size), jnp.float32),
        # linear_1: input_size -> input_size (stored [in, out])
        "w1": jax.random.normal(ks[4], (input_size, input_size), jnp.float32) * s_in,
        "b1": jax.random.normal(ks[5], (1, input_size), jnp.float32) * s_in,
        # linear_2: input_size -> 1 (stored [out, in] = [1, D] row)
        "w2": jax.random.normal(ks[6], (1, input_size), jnp.float32) * s_in,
        "b2": jax.random.normal(ks[7], (1, 1), jnp.float32) * s_in,
        # layer norms
        "gy": jnp.ones((1, input_size), jnp.float32),
        "by": jnp.zeros((1, input_size), jnp.float32),
        "gl": jnp.ones((1, input_size), jnp.float32),
        "bl": jnp.zeros((1, input_size), jnp.float32),
    }


if __name__ == "__main__":
    T, D = 256, 128                     # small demo: 256 frames, 128-d features
    key = jax.random.PRNGKey(0)
    k_x, k_p = jax.random.split(key)
    x = jax.random.normal(k_x, (T, D), jnp.float32)
    raw_params = init_params(k_p, input_size=D, output_size=D)
    params = prepare_params(raw_params)   # one-time weight prep (fused, scaled, bf16)

    ref = summarizer_reference(x, raw_params)

    # Small explicit tiles so the multi-tile flash grid (2x2) and the tiled
    # projection / head passes are all exercised at this demo size.
    out = summarizer_forward(x, params, tq=128, tk=128, tp=128, th=128)
    out = jax.block_until_ready(out)
    assert out.shape == (T, 1), out.shape
    assert bool(jnp.all(jnp.isfinite(out)))
    assert bool(jnp.all((out >= 0.0) & (out <= 1.0)))
    err = float(jnp.max(jnp.abs(out - ref)))
    assert err < 5e-2, f"max abs err {err} vs f32 reference (small tiles)"

    # Default (production-sized) tiles; _fit_tile clamps them to T and halves
    # tq so the "parallel" query axis has >= 2 steps.
    out2 = jax.block_until_ready(summarizer_forward(x, params))
    err2 = float(jnp.max(jnp.abs(out2 - ref)))
    assert err2 < 5e-2, f"max abs err {err2} vs f32 reference (default tiles)"

    print("KERNEL_OK")
</pallas_src>

<mosaic_0001>
module attributes {stable_mosaic.version = 11 : i64} {
  func.func @_qkv_proj_kernel(%arg0: i32, %arg1: memref<128x128xf32, #tpu.memory_space<vmem>>, %arg2: memref<128x384xbf16, #tpu.memory_space<vmem>>, %arg3: memref<128x128xbf16, #tpu.memory_space<vmem>>, %arg4: memref<128x128xbf16, #tpu.memory_space<vmem>>, %arg5: memref<128x128xbf16, #tpu.memory_space<vmem>>) attributes {dimension_semantics = [#tpu.dimension_semantics<parallel>], iteration_bounds = array<i64: 2>, scalar_prefetch = 0 : i64, scratch_operands = 0 : i64, tpu.core_type = #tpu.core_type<tc>, window_params = [{transform_indices = @transform_0, window_bounds = array<i64: 128, 128>}, {pipeline_mode = #tpu.pipeline_mode<synchronous>, transform_indices = @transform_1, window_bounds = array<i64: 128, 384>}, {transform_indices = @transform_2, window_bounds = array<i64: 128, 128>}, {transform_indices = @transform_3, window_bounds = array<i64: 128, 128>}, {transform_indices = @transform_4, window_bounds = array<i64: 128, 128>}]} {
    %c0 = arith.constant 0 : index
    %c0_0 = arith.constant 0 : index
    %0 = vector.load %arg1[%c0, %c0_0] : memref<128x128xf32, #tpu.memory_space<vmem>>, vector<128x128xf32>
    %1 = arith.truncf %0 : vector<128x128xf32> to vector<128x128xbf16>
    %c0_1 = arith.constant 0 : index
    %c0_2 = arith.constant 0 : index
    %2 = vector.load %arg2[%c0_1, %c0_2] : memref<128x384xbf16, #tpu.memory_space<vmem>>, vector<128x384xbf16>
    %cst = arith.constant dense<0.000000e+00> : vector<128x384xf32>
    %3 = tpu.matmul %1, %2, %cst {dimension_numbers = #tpu.dot_dimension_numbers<[1], [0], [0], [1], [0, 0, 1, 1], [], []>} : vector<128x128xbf16>, vector<128x384xbf16>, vector<128x384xf32> -> vector<128x384xf32>
    %4 = vector.extract_strided_slice %3 {offsets = [0, 0], sizes = [128, 128], strides = [1, 1]} : vector<128x384xf32> to vector<128x128xf32>
    %5 = arith.truncf %4 : vector<128x128xf32> to vector<128x128xbf16>
    %c0_3 = arith.constant 0 : index
    %c0_4 = arith.constant 0 : index
    %6 = vector.load %arg3[%c0_3, %c0_4] : memref<128x128xbf16, #tpu.memory_space<vmem>>, vector<128x128xbf16>
    tpu.vector_store %arg3[%c0_3, %c0_4], %5 {strides = array<i32>} : memref<128x128xbf16, #tpu.memory_space<vmem>>, vector<128x128xbf16>,
    %7 = vector.extract_strided_slice %3 {offsets = [0, 128], sizes = [128, 128], strides = [1, 1]} : vector<128x384xf32> to vector<128x128xf32>
    %8 = arith.truncf %7 : vector<128x128xf32> to vector<128x128xbf16>
    %c0_5 = arith.constant 0 : index
    %c0_6 = arith.constant 0 : index
    %9 = vector.load %arg4[%c0_5, %c0_6] : memref<128x128xbf16, #tpu.memory_space<vmem>>, vector<128x128xbf16>
    tpu.vector_store %arg4[%c0_5, %c0_6], %8 {strides = array<i32>} : memref<128x128xbf16, #tpu.memory_space<vmem>>, vector<128x128xbf16>,
    %10 = vector.extract_strided_slice %3 {offsets = [0, 256], sizes = [128, 128], strides = [1, 1]} : vector<128x384xf32> to vector<128x128xf32>
    %11 = arith.truncf %10 : vector<128x128xf32> to vector<128x128xbf16>
    %c0_7 = arith.constant 0 : index
    %c0_8 = arith.constant 0 : index
    %12 = vector.load %arg5[%c0_7, %c0_8] : memref<128x128xbf16, #tpu.memory_space<vmem>>, vector<128x128xbf16>
    tpu.vector_store %arg5[%c0_7, %c0_8], %11 {strides = array<i32>} : memref<128x128xbf16, #tpu.memory_space<vmem>>, vector<128x128xbf16>,
    return
  }
  func.func @transform_0(%arg0: i32) -> (i32, i32) {
    %c0_i32 = arith.constant 0 : i32
    %c0_i32_0 = arith.constant 0 : i32
    return %arg0, %c0_i32 : i32, i32
  }
  func.func @transform_1(%arg0: i32) -> (i32, i32) {
    %c0_i32 = arith.constant 0 : i32
    %c0_i32_0 = arith.constant 0 : i32
    %c0_i32_1 = arith.constant 0 : i32
    return %c0_i32, %c0_i32_0 : i32, i32
  }
  func.func @transform_2(%arg0: i32) -> (i32, i32) {
    %c0_i32 = arith.constant 0 : i32
    %c0_i32_0 = arith.constant 0 : i32
    return %arg0, %c0_i32 : i32, i32
  }
  func.func @transform_3(%arg0: i32) -> (i32, i32) {
    %c0_i32 = arith.constant 0 : i32
    %c0_i32_0 = arith.constant 0 : i32
    return %arg0, %c0_i32 : i32, i32
  }
  func.func @transform_4(%arg0: i32) -> (i32, i32) {
    %c0_i32 = arith.constant 0 : i32
    %c0_i32_0 = arith.constant 0 : i32
    return %arg0, %c0_i32 : i32, i32
  }
}

module attributes {stable_mosaic.version = 11 : i64} {
  func.func @_qkv_proj_kernel(%arg0: i32, %arg1: memref<128x128xf32, #tpu.memory_space<vmem>>, %arg2: memref<128x384xbf16, #tpu.memory_space<vmem>>, %arg3: memref<128x128xbf16, #tpu.memory_space<vmem>>, %arg4: memref<128x128xbf16, #tpu.memory_space<vmem>>, %arg5: memref<128x128xbf16, #tpu.memory_space<vmem>>) attributes {dimension_semantics = [#tpu.dimension_semantics<parallel>], iteration_bounds = array<i64: 2>, scalar_prefetch = 0 : i64, scratch_operands = 0 : i64, tpu.core_type = #tpu.core_type<tc>, window_params = [{transform_indices = @transform_0, window_bounds = array<i64: 128, 128>}, {pipeline_mode = #tpu.pipeline_mode<synchronous>, transform_indices = @transform_1, window_bounds = array<i64: 128, 384>}, {transform_indices = @transform_2, window_bounds = array<i64: 128, 128>}, {transform_indices = @transform_3, window_bounds = array<i64: 128, 128>}, {transform_indices = @transform_4, window_bounds = array<i64: 128, 128>}]} {
    %c0 = arith.constant 0 : index
    %c0_0 = arith.constant 0 : index
    %0 = vector.load %arg1[%c0, %c0_0] : memref<128x128xf32, #tpu.memory_space<vmem>>, vector<128x128xf32>
    %1 = arith.truncf %0 : vector<128x128xf32> to vector<128x128xbf16>
    %c0_1 = arith.constant 0 : index
    %c0_2 = arith.constant 0 : index
    %2 = vector.load %arg2[%c0_1, %c0_2] : memref<128x384xbf16, #tpu.memory_space<vmem>>, vector<128x384xbf16>
    %cst = arith.constant dense<0.000000e+00> : vector<128x384xf32>
    %3 = tpu.matmul %1, %2, %cst {dimension_numbers = #tpu.dot_dimension_numbers<[1], [0], [0], [1], [0, 0, 1, 1], [], []>} : vector<128x128xbf16>, vector<128x384xbf16>, vector<128x384xf32> -> vector<128x384xf32>
    %4 = vector.extract_strided_slice %3 {offsets = [0, 0], sizes = [128, 128], strides = [1, 1]} : vector<128x384xf32> to vector<128x128xf32>
    %5 = arith.truncf %4 : vector<128x128xf32> to vector<128x128xbf16>
    %c0_3 = arith.constant 0 : index
    %c0_4 = arith.constant 0 : index
    %6 = vector.load %arg3[%c0_3, %c0_4] : memref<128x128xbf16, #tpu.memory_space<vmem>>, vector<128x128xbf16>
    tpu.vector_store %arg3[%c0_3, %c0_4], %5 {strides = array<i32>} : memref<128x128xbf16, #tpu.memory_space<vmem>>, vector<128x128xbf16>,
    %7 = vector.extract_strided_slice %3 {offsets = [0, 128], sizes = [128, 128], strides = [1, 1]} : vector<128x384xf32> to vector<128x128xf32>
    %8 = arith.truncf %7 : vector<128x128xf32> to vector<128x128xbf16>
    %c0_5 = arith.constant 0 : index
    %c0_6 = arith.constant 0 : index
    %9 = vector.load %arg4[%c0_5, %c0_6] : memref<128x128xbf16, #tpu.memory_space<vmem>>, vector<128x128xbf16>
    tpu.vector_store %arg4[%c0_5, %c0_6], %8 {strides = array<i32>} : memref<128x128xbf16, #tpu.memory_space<vmem>>, vector<128x128xbf16>,
    %10 = vector.extract_strided_slice %3 {offsets = [0, 256], sizes = [128, 128], strides = [1, 1]} : vector<128x384xf32> to vector<128x128xf32>
    %11 = arith.truncf %10 : vector<128x128xf32> to vector<128x128xbf16>
    %c0_7 = arith.constant 0 : index
    %c0_8 = arith.constant 0 : index
    %12 = vector.load %arg5[%c0_7, %c0_8] : memref<128x128xbf16, #tpu.memory_space<vmem>>, vector<128x128xbf16>
    tpu.vector_store %arg5[%c0_7, %c0_8], %11 {strides = array<i32>} : memref<128x128xbf16, #tpu.memory_space<vmem>>, vector<128x128xbf16>,
    return
  }
  func.func @transform_0(%arg0: i32) -> (i32, i32) {
    %c0_i32 = arith.constant 0 : i32
    %c0_i32_0 = arith.constant 0 : i32
    return %arg0, %c0_i32 : i32, i32
  }
  func.func @transform_1(%arg0: i32) -> (i32, i32) {
    %c0_i32 = arith.constant 0 : i32
    %c0_i32_0 = arith.constant 0 : i32
    %c0_i32_1 = arith.constant 0 : i32
    return %c0_i32, %c0_i32_0 : i32, i32
  }
  func.func @transform_2(%arg0: i32) -> (i32, i32) {
    %c0_i32 = arith.constant 0 : i32
    %c0_i32_0 = arith.constant 0 : i32
    return %arg0, %c0_i32 : i32, i32
  }
  func.func @transform_3(%arg0: i32) -> (i32, i32) {
    %c0_i32 = arith.constant 0 : i32
    %c0_i32_0 = arith.constant 0 : i32
    return %arg0, %c0_i32 : i32, i32
  }
  func.func @transform_4(%arg0: i32) -> (i32, i32) {
    %c0_i32 = arith.constant 0 : i32
    %c0_i32_0 = arith.constant 0 : i32
    return %arg0, %c0_i32 : i32, i32
  }
}

</mosaic_0001>

<bundles_post_ra>
// kernel: tpu_custom_call.1
= control target key start
LH: loop header
LB: loop body
LE: loop exit
PB: predicated region body
PF: predicated region fallthrough
CT: control target
= control target key end

     0   :  { %s2095_s0 = inlined_call_operand.hbm [shape: f32[256,128], index: 0, kind: input, shape index: {}]   ;;  %s2096_s1 = inlined_call_operand.hbm [shape: bf16[128,384], index: 1, kind: input, shape index: {}]   ;;  %s2097_s2 = inlined_call_operand.hbm [shape: bf16[256,128], index: 2, kind: output, shape index: {0}]   ;;  %s2098_s3 = inlined_call_operand.hbm [shape: bf16[256,128], index: 3, kind: output, shape index: {1}]   ;;  %s2099_s4 = inlined_call_operand.hbm [shape: bf16[256,128], index: 4, kind: output, shape index: {2}]  }
   0x1   :  { %2104 = sst [smem:[#allocation15_spill]] %s2095_s0 }
   0x2   :  { %10 = vsyncpa [#allocation3], 0 }
   0x3   :  { %12 = vsyncpa [#allocation3 + $0x1], 0 }
   0x4   :  { %13 = vsyncpa [#allocation6], 0 }
   0x5   :  { %14 = vsyncpa [#allocation4], 0 }
   0x6   :  { %16 = vsyncpa [#allocation4 + $0x1], 0 }
   0x7   :  { %17 = vsyncpa [#allocation9], 0 }
   0x8   :  { %19 = vsyncpa [#allocation9 + $0x1], 0  ;;  %s1758_s15 = smov 0   ;;  %s1760_s16 = smov 0  }
   0x9   :  { %s1762_s17 = smov 0   ;;  %s1764_s18 = smov 0  }
   0xa LB: > { %s1779_s19 = sadd.s32 4294967295, %s1719_s18   ;;  %s2103_s20 = sadd.s32 4294967294, %s1719_s18   ;;  %s1719_s18 = sphi %s1764_s18, %s2124_s18   ;;  %s1715_s17 = sphi %s1762_s17, %s2123_s17   ;;  %s1711_s16 = sphi %s1760_s16, %s2122_s16   ;;  %s1707_s15 = sphi %s1758_s15, %s2121_s15  }
   0xb   : > { %p45_p0 = scmp.ne.s32.totalorder %s1711_s16, %s1707_s15  ;;  %p2100_p1 = scmp.eq.s32.totalorder %s1779_s19, 0 }
   0xc   : > { %p96_p3 = scmp.eq.s32.totalorder %s2103_s20, 1  ;;  %p1089_p5 = scmp.ge.s32.totalorder %s1719_s18, 1 }
   0xd   : > { %p1790_p4 = por %p2100_p1, %p45_p0  ;;  %p155_p7 = scmp.lt.s32.totalorder %s1719_s18, 3 }
   0xe   : > { %p1795_p6 = por %p96_p3, %p45_p0  ;;  %s1721_s24 = smov [#allocation5]  }
   0xf   : > { %s2105_s21 = scalar_select %p1790_p4, 1, 0 }
  0x10   : > { %s2106_s22 = scalar_select %p1795_p6, 1, 0 }
  0x11   : > { %p1800_p8 = pnand %p1089_p5, %p155_p7  ;;  %s167_s25 = sshll.u32 %s1721_s24, 4  ;;  %s1804_s25 = int_to_ptr.vmem [resolvable:$true] %s167_s25 }
  0x12   : > { %s1816_s27 = sadd.s32 1, %s1719_s18   ;;  %s32_s28 = sadd.s32 1, %s1715_s17 }
  0x13   : > { %s2107_s23 = scalar_select %p1800_p8, 1, 0 }
  0x14   : > { %p1437_p9 = pneg %p1800_p8  ;;  %s29_s29 = ssub.s32 %s1719_s18, %s1816_s27 }
  0x15   : > { %s1531_s6 = scalar_lea.hbm %s2096_s1, 3072 }
  0x16   : > { %p1811_p11 = pnand %p1437_p9, %p2100_p1  ;;  %p1532_p12 = scmp.ne.s32.totalorder %s2096_s1, %s1531_s6 }
  0x17   : > { %p1538_p5 = scmp.lt.u32.totalorder %s1531_s6, %s2096_s1 }
  0x18   : > { %p1533_p13 = pneg %p1811_p11 }
  0x1a   : > { %p1534_p0 = pnand %p1533_p13, %p1532_p12 }
  0x1c   : > { %p1535_p3 = pneg %p1534_p0 }
  0x1e   : > { %p1540_p7 = pnand %p1538_p5, %p1535_p3 }
  0x20   : > { %1543 = shalt.err (!%p1540_p7)
}
  0x21   : > { %s1544_s11 = scalar_lea.vmem %s1804_s25, 3072  ;;  %p1552_p2 = scmp.lt.s32.totalorder %s1804_s25, %s1804_s25 }
  0x22   : > { %p1545_p9 = scmp.ne.s32.totalorder %s1804_s25, %s1544_s11  ;;  %p1553_p6 = scmp.lt.s32.totalorder %s1544_s11, %s1544_s11 }
  0x24   : > { %p1547_p10 = pnand %p1545_p9, %p1533_p13  ;;  %p1554_p4 = por %p1553_p6, %p1552_p2 }
  0x26   : > { %p1548_p1 = pneg %p1547_p10 }
  0x28   : > { %p1555_p8 = pnand %p1554_p4, %p1548_p1 }
  0x2a   : > { %1558 = shalt.err (!%p1555_p8)
}
  0x2b   : > { %s1722_s12 = smov 192   ;;  %s1723_s13 = smov 12  }
  0x2c   : > { %1440 = dma.hbm_to_vmem [thread:$0]  (!%p1811_p11), %s2096_s1, 3072, %s1804_s25, [#allocation6], %s1722_s12, %s1722_s12, %s1723_s13  }
  0x2d   : > { %p30_p2 = scmp.eq.s32.totalorder %s29_s29, 0  ;;  %p39_p1 = scmp.ne.s32.totalorder %s1715_s17, %s1711_s16 }
  0x2e   : > { %p40_p4 = scmp.eq.s32.totalorder %s1719_s18, 0  ;;  %p1456_p6 = scmp.lt.s32.totalorder %s1719_s18, 2 }
  0x2f   : > { %s1847_s30 = scalar_select %p30_p2, %s1715_s17, %s32_s28  }
  0x30   : > { %p41_p8 = por %p40_p4, %p39_p1  ;;  %p2109_p10 = scmp.eq.s32.totalorder %s1779_s19, 1 }
  0x31   : > { %s181_s6 = sand.u32 1, %s1715_s17   ;;  %s1184_s7 = sshll.u32 %s1719_s18, 11 }
  0x32   : > { %p1851_p12 = por %p2109_p10, %p39_p1  ;;  %s1092_s8 = sshll.u32 %s181_s6, 7 }
  0x33   : > { %s2111_s0 = sld [smem:[#allocation15_spill]]  ;;  %s185_s25 = scalar_lea.vmem [#allocation2], %s1092_s8 }
  0x34   : > { %s192_s28 = sshll.u32 %s185_s25, 4  ;;  %p1862_p11 = pnand %p1456_p6, %p41_p8  ;;  %s1866_s28 = int_to_ptr.vmem [resolvable:$true] %s192_s28 }
  0x35   : > { %s1868_s11 = scalar_lea.sflag [#allocation3], %s181_s6 }
  0x36   : > { %p1561_p0 = pneg %p1862_p11 }
  0x39   : > { %s1860_s10 = scalar_lea.hbm %s2111_s0, %s1184_s7  ;;  %s1564_s24 = scalar_lea.hbm %s2111_s0, 4096 }
  0x3a   : > { %s1559_s12 = scalar_lea.hbm %s1860_s10, 2048  ;;  %p1565_p7 = scmp.lt.u32.totalorder %s1860_s10, %s2111_s0 }
  0x3b   : > { %p1560_p13 = scmp.ne.s32.totalorder %s1860_s10, %s1559_s12  ;;  %p1566_p9 = scmp.lt.u32.totalorder %s1564_s24, %s1559_s12 }
  0x3c   : > { %p1568_p1 = scmp.lt.u32.totalorder %s1559_s12, %s1860_s10 }
  0x3d   : > { %p1562_p3 = pnand %p1561_p0, %p1560_p13  ;;  %p1567_p2 = por %p1566_p9, %p1565_p7 }
  0x3f   : > { %p1563_p5 = pneg %p1562_p3  ;;  %p1569_p4 = por %p1568_p1, %p1567_p2 }
  0x41   : > { %p1570_p6 = pnand %p1569_p4, %p1563_p5 }
  0x43   : > { %1573 = shalt.err (!%p1570_p6)
}
  0x44   : > { %s1574_s6 = scalar_lea.vmem %s1866_s28, 2048  ;;  %s1724_s26 = smov [#allocation2]  }
  0x45   : > { %p1575_p8 = scmp.ne.s32.totalorder %s1866_s28, %s1574_s6  ;;  %s1579_s9 = sshll.u32 %s1724_s26, 4  ;;  %s1580_s9 = int_to_ptr.vmem [resolvable:$false] %s1579_s9 }
  0x46   : > { %s1581_s25 = scalar_lea.vmem %s1580_s9, 4096  ;;  %p1582_p3 = scmp.lt.s32.totalorder %s1866_s28, %s1580_s9 }
  0x47   : > { %p1577_p10 = pnand %p1575_p8, %p1561_p0  ;;  %p1583_p7 = scmp.lt.s32.totalorder %s1581_s25, %s1574_s6 }
  0x49   : > { %p1578_p13 = pneg %p1577_p10  ;;  %p1584_p9 = por %p1583_p7, %p1582_p3 }
  0x4b   : > { %p1585_p2 = pnand %p1584_p9, %p1578_p13 }
  0x4d   : > { %1588 = shalt.err (!%p1585_p2)
}
  0x4e   : > { %s1725_s12 = smov 128   ;;  %s1726_s13 = smov 8  }
  0x4f   : > { %1444 = dma.hbm_to_vmem [thread:$0]  (!%p1862_p11), %s1860_s10, 2048, %s1866_s28, %s1868_s11, %s1725_s12, %s1725_s12, %s1726_s13  }
  0x50   : > { %p2113_p0 = scmp.ne.s32.totalorder %s2107_s23, 0 }
  0x51   : > { %s1899_s14 = sand.u32 (!%p2113_p0), 1, %s1711_s16   ;;  %p2114_p5 = scmp.ne.s32.totalorder (!%p2113_p0), %s2105_s21, 0 }
  0x52   : > { %204 = sbr.rel (%p2113_p0) target bundleno = 460 (0x1cc), region = 28  ;;  %s1096_s24 = sshll.u32 (!%p2113_p0), %s1899_s14, 7 }
  0x53   : > { %s207_s7 = scalar_lea.sflag (!%p2113_p0), [#allocation3], %s1899_s14  ;;  %s1903_s8 = scalar_lea.vmem (!%p2113_p0), [#allocation2], %s1096_s24 }
  0x59   : > { %1690 = dma.done.wait (%p2114_p5), %s207_s7, 2048  }
  0x5a   : > { %1692 = vsyncadd (%p2114_p5), %s207_s7, 4294965248  ;;  %p2115_p11 = scmp.eq.s32.totalorder %s1779_s19, 0 }
  0x5c   : > { %1694 = dma.done.wait (%p2115_p11), [#allocation6], 3072   ;;  %p2116_p1 = pmov %p2115_p11 }
  0x5d   : > { %v1727_v0 = vmov 0   ;;  %v1499_v1 = vld [vmem:[#allocation5 + $0x4] ss:$12 sps:$4 sm:$0xff]   ;;  %v1501_v2 = vld [vmem:[#allocation5] ss:$12 sps:$4 sm:$0xff]   ;;  %v257_v28 = vld [vmem:[%s1903_s8 + $0x18] sm:$0xff] }
  0x5e   : > { %1696 = vsyncadd (%p2116_p1), [#allocation6], 4294964224  ;;  %470 = vmatprep.mubr.bf16.mxu0 %v1727_v0  ;;  %438 = vmatprep.subr.bf16.mxu0 %v1499_v1  ;;  %v1502_v3 = vld [vmem:[#allocation5 + $0x1c] ss:$12 sps:$4 sm:$0xff]   ;;  %v1504_v4 = vld [vmem:[#allocation5 + $0x18] ss:$12 sps:$4 sm:$0xff]  }
  0x5f   : > { %439 = vmatpush1.bf16.msra.mxu0 %v1501_v2  ;;  %v1505_v5 = vld [vmem:[#allocation5 + $0x34] ss:$12 sps:$4 sm:$0xff]   ;;  %v1507_v6 = vld [vmem:[#allocation5 + $0x30] ss:$12 sps:$4 sm:$0xff]   ;;  %v1508_v7 = vld [vmem:[#allocation5 + $0x4c] ss:$12 sps:$4 sm:$0xff]  }
  0x60   : > { %440 = vmatprep.subr.bf16.mxu0 %v1502_v3  ;;  %v1510_v8 = vld [vmem:[#allocation5 + $0x48] ss:$12 sps:$4 sm:$0xff]   ;;  %v1511_v9 = vld [vmem:[#allocation5 + $0x64] ss:$12 sps:$4 sm:$0xff]   ;;  %v1524_v13 = vld [vmem:[#allocation5 + $0x20] ss:$12 sps:$4 sm:$0xff]  }
  0x61   : > { %v1523_v10 = vld [vmem:[#allocation5 + $0x8] ss:$12 sps:$4 sm:$0xff]   ;;  %v254_v11 = vld [vmem:[%s1903_s8] sm:$0xff]  ;;  %v1526_v19 = vld [vmem:[#allocation5 + $0x50] ss:$12 sps:$4 sm:$0xff]   ;;  %s1098_s21 = sshll.u32 %s1899_s14, 6 }
  0x62   : > { %v255_v12 = vld [vmem:[%s1903_s8 + $0x8] sm:$0xff]  ;;  %1393 = vmatprep.subr.bf16.mxu1 %v1523_v10  ;;  %v1525_v16 = vld [vmem:[#allocation5 + $0x38] ss:$12 sps:$4 sm:$0xff]   ;;  %v1517_v20 = vld [vmem:[#allocation5 + $0x94] ss:$12 sps:$4 sm:$0xff]   ;;  %s1938_s23 = scalar_lea.vmem [#allocation7], %s1098_s21 }
  0x63   : > { %441 = vmatpush1.bf16.msra.mxu0 %v1504_v4  ;;  %v1513_v14 = vld [vmem:[#allocation5 + $0x60] ss:$12 sps:$4 sm:$0xff]   ;;  %1394 = vmatpush3.bf16.msra.mxu1 %v1523_v10  ;;  %v270_v15 = vpack.c.bf16 %v255_v12, %v254_v11  ;;  %v1514_v17 = vld [vmem:[#allocation5 + $0x7c] ss:$12 sps:$4 sm:$0xff]   ;;  %v1516_v18 = vld [vmem:[#allocation5 + $0x78] ss:$12 sps:$4 sm:$0xff]  }
  0x64   : > { %442 = vmatprep.subr.bf16.mxu0 %v1505_v5  ;;  %1395 = vmatprep.subr.bf16.mxu1 %v1524_v13  ;;  %v1519_v21 = vld [vmem:[#allocation5 + $0x90] ss:$12 sps:$4 sm:$0xff]   ;;  %v1527_v22 = vld [vmem:[#allocation5 + $0x68] ss:$12 sps:$4 sm:$0xff]   ;;  %v1520_v23 = vld [vmem:[#allocation5 + $0xac] ss:$12 sps:$4 sm:$0xff]  }
  0x65   : > { %1409 = vmatprep.mubr.bf16.mxu1 %v270_v15  ;;  %v1522_v24 = vld [vmem:[#allocation5 + $0xa8] ss:$12 sps:$4 sm:$0xff]   ;;  %v1528_v25 = vld [vmem:[#allocation5 + $0x80] ss:$12 sps:$4 sm:$0xff]   ;;  %v1529_v26 = vld [vmem:[#allocation5 + $0x98] ss:$12 sps:$4 sm:$0xff]  }
  0x66   : > { %v256_v27 = vld [vmem:[%s1903_s8 + $0x10] sm:$0xff]  ;;  %v258_v31 = vld [vmem:[%s1903_s8 + $0x20] sm:$0xff]  ;;  %v259_v32 = vld [vmem:[%s1903_s8 + $0x28] sm:$0xff]  ;;  %s1941_s10 = scalar_lea.vmem [#allocation8], %s1098_s21  ;;  %s1946_s28 = scalar_lea.vmem [#allocation10], %s1098_s21 }
  0x67   : > { %443 = vmatpush1.bf16.msra.mxu0 %v1507_v6  ;;  %1396 = vmatpush3.bf16.msra.mxu1 %v1524_v13  ;;  %v1530_v29 = vld [vmem:[#allocation5 + $0xb0] ss:$12 sps:$4 sm:$0xff]   ;;  %v271_v30 = vpack.c.bf16 %v257_v28, %v256_v27  ;;  %v272_v33 = vpack.c.bf16 %v259_v32, %v258_v31  ;;  %v262_v36 = vld [vmem:[%s1903_s8 + $0x40] sm:$0xff]  ;;  %v263_v37 = vld [vmem:[%s1903_s8 + $0x48] sm:$0xff]  ;;  %s912_s29 = sshll.u32 %s1938_s23, 4  ;;  %s928_s11 = sshll.u32 %s1941_s10, 4  ;;  %s1968_s29 = int_to_ptr.vmem [resolvable:$true] %s912_s29  ;;  %s1970_s11 = int_to_ptr.vmem [resolvable:$true] %s928_s11 }
  0x68   : > { %444 = vmatprep.subr.bf16.mxu0 %v1508_v7  ;;  %1397 = vmatprep.subr.bf16.mxu1 %v1525_v16  ;;  %v260_v34 = vld [vmem:[%s1903_s8 + $0x30] sm:$0xff]  ;;  %v261_v35 = vld [vmem:[%s1903_s8 + $0x38] sm:$0xff]  ;;  %v274_v39 = vpack.c.bf16 %v263_v37, %v262_v36  ;;  %v266_v42 = vld [vmem:[%s1903_s8 + $0x60] sm:$0xff]  ;;  %s1233_s6 = sshll.u32 %s1779_s19, 10  ;;  %s944_s26 = sshll.u32 %s1946_s28, 4  ;;  %s1985_s26 = int_to_ptr.vmem [resolvable:$true] %s944_s26 }
  0x69   : > { %v273_v38 = vpack.c.bf16 %v261_v35, %v260_v34  ;;  %v264_v40 = vld [vmem:[%s1903_s8 + $0x50] sm:$0xff]  ;;  %v265_v41 = vld [vmem:[%s1903_s8 + $0x58] sm:$0xff]  ;;  %v267_v43 = vld [vmem:[%s1903_s8 + $0x68] sm:$0xff]  ;;  %s1978_s13 = scalar_lea.hbm %s2097_s2, %s1233_s6  ;;  %s1991_s20 = scalar_lea.hbm %s2099_s4, %s1233_s6 }
  0x6a   : > { %v275_v44 = vpack.c.bf16 %v265_v41, %v264_v40  ;;  %v276_v45 = vpack.c.bf16 %v267_v43, %v266_v42  ;;  %v268_v46 = vld [vmem:[%s1903_s8 + $0x70] sm:$0xff]  ;;  %v269_v47 = vld [vmem:[%s1903_s8 + $0x78] sm:$0xff]  ;;  %s1983_s8 = scalar_lea.hbm %s2098_s3, %s1233_s6  ;;  %s889_s9 = scalar_lea.sflag [#allocation4], %s1899_s14 }
  0x6b   : > { %445 = vmatpush1.bf16.msra.mxu0 %v1510_v8  ;;  %1398 = vmatpush3.bf16.msra.mxu1 %v1525_v16  ;;  %v277_v48 = vpack.c.bf16 %v269_v47, %v268_v46  ;;  %s1589_s25 = scalar_lea.vmem %s1968_s29, 1024  ;;  %s1728_s12 = smov [#allocation7]  }
  0x6c   : > { %446 = vmatprep.subr.bf16.mxu0 %v1511_v9  ;;  %1399 = vmatprep.subr.bf16.mxu1 %v1526_v19  ;;  %p1590_p4 = scmp.ne.s32.totalorder %s1968_s29, %s1589_s25  ;;  %s1593_s0 = sshll.u32 %s1728_s12, 4  ;;  %s1594_s0 = int_to_ptr.vmem [resolvable:$false] %s1593_s0 }
  0x6d   : > { %s1595_s24 = scalar_lea.vmem %s1594_s0, 2048  ;;  %p1596_p10 = scmp.lt.s32.totalorder %s1968_s29, %s1594_s0 }
  0x6e   : > { %p1591_p6 = pnand %p1590_p4, %p1851_p12  ;;  %p1597_p13 = scmp.lt.s32.totalorder %s1595_s24, %s1589_s25 }
  0x6f   : > { %447 = vmatpush1.bf16.msra.mxu0 %v1513_v14  ;;  %1400 = vmatpush3.bf16.msra.mxu1 %v1526_v19 }
  0x70   : > { %448 = vmatprep.subr.bf16.mxu0 %v1514_v17  ;;  %1401 = vmatprep.subr.bf16.mxu1 %v1527_v22  ;;  %p1592_p8 = pneg %p1591_p6  ;;  %p1598_p3 = por %p1597_p13, %p1596_p10 }
  0x72   : > { %p1599_p7 = pnand %p1598_p3, %p1592_p8 }
  0x73   : > { %449 = vmatpush1.bf16.msra.mxu0 %v1516_v18  ;;  %1402 = vmatpush3.bf16.msra.mxu1 %v1527_v22 }
  0x74   : > { %450 = vmatprep.subr.bf16.mxu0 %v1517_v20  ;;  %1403 = vmatprep.subr.bf16.mxu1 %v1528_v25 }
  0x77   : > { %451 = vmatpush1.bf16.msra.mxu0 %v1519_v21  ;;  %1404 = vmatpush3.bf16.msra.mxu1 %v1528_v25 }
  0x78   : > { %452 = vmatprep.subr.bf16.mxu0 %v1520_v23  ;;  %1405 = vmatprep.subr.bf16.mxu1 %v1529_v26 }
  0x7b   : > { %453 = vmatpush1.bf16.msra.mxu0 %v1522_v24  ;;  %1406 = vmatpush3.bf16.msra.mxu1 %v1529_v26 }
  0x7c   : > { %1407 = vmatprep.subr.bf16.mxu1 %v1530_v29 }
  0x7e   : > { %471 = vmatmul.mubr.bf16.vlgmr.msra.gmra.mrb[0].mxu0 %v270_v15 }
  0x7f   : > { %480 = vmatprep.mubr.bf16.mxu0 %v1727_v0  ;;  %1408 = vmatpush3.bf16.msra.mxu1 %v1530_v29 }
  0x82   : > { %1410 = vmatmul.mubr.bf16.vlgmr.msra.gmra.mrb[0].mxu1 %v271_v30 }
  0x83   : > { %1413 = vmatprep.mubr.bf16.mxu1 %v272_v33 }
  0x86   : > { %481 = vmatmul.mubr.bf16.gmra.mrb[4].mxu0 %v271_v30 }
  0x87   : > { %490 = vmatprep.mubr.bf16.mxu0 %v1727_v0 }
  0x8a   : > { %1414 = vmatmul.mubr.bf16.gmra.mrb[4].mxu1 %v273_v38 }
  0x8b   : > { %1417 = vmatprep.mubr.bf16.mxu1 %v274_v39 }
  0x8e   : > { %491 = vmatmul.mubr.bf16.gmra.mrb[8].mxu0 %v272_v33 }
  0x8f   : > { %500 = vmatprep.mubr.bf16.mxu0 %v1727_v0 }
  0x92   : > { %1418 = vmatmul.mubr.bf16.gmra.mrb[8].mxu1 %v275_v44 }
  0x93   : > { %1421 = vmatprep.mubr.bf16.mxu1 %v276_v45 }
  0x96   : > { %501 = vmatmul.mubr.bf16.gmra.mrb[12].mxu0 %v273_v38 }
  0x97   : > { %510 = vmatprep.mubr.bf16.mxu0 %v1727_v0 }
  0x9a   : > { %1422 = vmatmul.mubr.bf16.gmra.mrb[12].mxu1 %v277_v48 }
  0x9e   : > { %511 = vmatmul.mubr.bf16.gmra.mrb[16].mxu0 %v274_v39 }
  0x9f   : > { %520 = vmatprep.mubr.bf16.mxu0 %v1727_v0 }
  0xa6   : > { %521 = vmatmul.mubr.bf16.gmra.mrb[20].mxu0 %v275_v44 }
  0xa7   : > { %530 = vmatprep.mubr.bf16.mxu0 %v1727_v0 }
  0xae   : > { %531 = vmatmul.mubr.bf16.gmra.mrb[24].mxu0 %v276_v45 }
  0xaf   : > { %540 = vmatprep.mubr.bf16.mxu0 %v1727_v0 }
  0xb6   : > { %541 = vmatmul.mubr.bf16.gmra.mrb[28].mxu0 %v277_v48 }
 0x151   : > { %v472_v49 = vpop.f32.mrb[0].mxu0 }
 0x152   : > { %v474_v50 = vpop.f32.mrb[1].mxu0 }
 0x153   : > { %v476_v51 = vpop.f32.mrb[2].mxu0 }
 0x154   : > { %v1239_v52 = vpack.c.bf16 %v476_v51, %v472_v49  ;;  %v478_v53 = vpop.f32.mrb[3].mxu0 }
 0x155   : > { %v1279_v54 = vpack.c.bf16 %v478_v53, %v474_v50  ;;  %v1411_v60 = vpop.f32.mrb[0].mxu1 }
 0x156   : > { %1240 = vst [vmem:[%s1938_s23] sm:$0xff] %v1239_v52   ;;  %v585_v62 = vpop.f32.mrb[1].mxu1 }
 0x157   : > { %1280 = vst [vmem:[%s1941_s10] sm:$0xff] %v1279_v54   ;;  %v1412_v63 = vpop.f32.mrb[2].mxu1 }
 0x158   : > { %v1324_v0 = vpack.c.bf16 %v1412_v63, %v1411_v60  ;;  %v588_v1 = vpop.f32.mrb[3].mxu1 }
 0x159   : > { %v482_v55 = vpop.f32.mrb[4].mxu0  ;;  %v1319_v2 = vpack.c.bf16 %v588_v1, %v585_v62 }
 0x15a   : > { %v484_v56 = vpop.f32.mrb[5].mxu0  ;;  %1370 = vst [vmem:[%s1946_s28 + $0x8] sm:$0xff] %v1324_v0  }
 0x15b   : > { %v486_v57 = vpop.f32.mrb[6].mxu0  ;;  %1320 = vst [vmem:[%s1946_s28] sm:$0xff] %v1319_v2  }
 0x15c   : > { %v1244_v58 = vpack.c.bf16 %v486_v57, %v482_v55  ;;  %v488_v59 = vpop.f32.mrb[7].mxu0 }
 0x15d   : > { %v1284_v61 = vpack.c.bf16 %v488_v59, %v484_v56  ;;  %v1415_v8 = vpop.f32.mrb[4].mxu1 }
 0x15e   : > { %1356 = vst [vmem:[%s1938_s23 + $0x8] sm:$0xff] %v1244_v58   ;;  %v601_v10 = vpop.f32.mrb[5].mxu1 }
 0x15f   : > { %1363 = vst [vmem:[%s1941_s10 + $0x8] sm:$0xff] %v1284_v61   ;;  %v1416_v11 = vpop.f32.mrb[6].mxu1 }
 0x160   : > { %v1334_v12 = vpack.c.bf16 %v1416_v11, %v1415_v8  ;;  %v604_v13 = vpop.f32.mrb[7].mxu1 }
 0x161   : > { %v492_v3 = vpop.f32.mrb[8].mxu0  ;;  %v1329_v14 = vpack.c.bf16 %v604_v13, %v601_v10 }
 0x162   : > { %v494_v4 = vpop.f32.mrb[9].mxu0  ;;  %1372 = vst [vmem:[%s1946_s28 + $0x18] sm:$0xff] %v1334_v12  }
 0x163   : > { %v496_v5 = vpop.f32.mrb[10].mxu0  ;;  %1371 = vst [vmem:[%s1946_s28 + $0x10] sm:$0xff] %v1329_v14  }
 0x164   : > { %v1249_v6 = vpack.c.bf16 %v496_v5, %v492_v3  ;;  %v498_v7 = vpop.f32.mrb[11].mxu0 }
 0x165   : > { %v1289_v9 = vpack.c.bf16 %v498_v7, %v494_v4  ;;  %v1419_v20 = vpop.f32.mrb[8].mxu1 }
 0x166   : > { %1357 = vst [vmem:[%s1938_s23 + $0x10] sm:$0xff] %v1249_v6   ;;  %v617_v22 = vpop.f32.mrb[9].mxu1 }
 0x167   : > { %1364 = vst [vmem:[%s1941_s10 + $0x10] sm:$0xff] %v1289_v9   ;;  %v1420_v23 = vpop.f32.mrb[10].mxu1 }
 0x168   : > { %v1344_v24 = vpack.c.bf16 %v1420_v23, %v1419_v20  ;;  %v620_v25 = vpop.f32.mrb[11].mxu1 }
 0x169   : > { %v502_v15 = vpop.f32.mrb[12].mxu0  ;;  %v1339_v26 = vpack.c.bf16 %v620_v25, %v617_v22 }
 0x16a   : > { %v504_v16 = vpop.f32.mrb[13].mxu0  ;;  %1374 = vst [vmem:[%s1946_s28 + $0x28] sm:$0xff] %v1344_v24  }
 0x16b   : > { %v506_v17 = vpop.f32.mrb[14].mxu0  ;;  %1373 = vst [vmem:[%s1946_s28 + $0x20] sm:$0xff] %v1339_v26  }
 0x16c   : > { %v1254_v18 = vpack.c.bf16 %v506_v17, %v502_v15  ;;  %v508_v19 = vpop.f32.mrb[15].mxu0 }
 0x16d   : > { %v1294_v21 = vpack.c.bf16 %v508_v19, %v504_v16  ;;  %v1423_v32 = vpop.f32.mrb[12].mxu1 }
 0x16e   : > { %1358 = vst [vmem:[%s1938_s23 + $0x18] sm:$0xff] %v1254_v18   ;;  %v633_v34 = vpop.f32.mrb[13].mxu1 }
 0x16f   : > { %1365 = vst [vmem:[%s1941_s10 + $0x18] sm:$0xff] %v1294_v21   ;;  %v1424_v35 = vpop.f32.mrb[14].mxu1 }
 0x170   : > { %v1354_v36 = vpack.c.bf16 %v1424_v35, %v1423_v32  ;;  %v636_v37 = vpop.f32.mrb[15].mxu1 }
 0x171   : > { %v512_v27 = vpop.f32.mrb[16].mxu0  ;;  %v1349_v38 = vpack.c.bf16 %v636_v37, %v633_v34 }
 0x172   : > { %v514_v28 = vpop.f32.mrb[17].mxu0  ;;  %1376 = vst [vmem:[%s1946_s28 + $0x38] sm:$0xff] %v1354_v36  }
 0x173   : > { %v516_v29 = vpop.f32.mrb[18].mxu0  ;;  %1375 = vst [vmem:[%s1946_s28 + $0x30] sm:$0xff] %v1349_v38  }
 0x174   : > { %v1259_v30 = vpack.c.bf16 %v516_v29, %v512_v27  ;;  %v518_v31 = vpop.f32.mrb[19].mxu0 }
 0x175   : > { %v1299_v33 = vpack.c.bf16 %v518_v31, %v514_v28 }
 0x176   : > { %1359 = vst [vmem:[%s1938_s23 + $0x20] sm:$0xff] %v1259_v30  }
 0x177   : > { %1366 = vst [vmem:[%s1941_s10 + $0x20] sm:$0xff] %v1299_v33  }
 0x179   : > { %v522_v39 = vpop.f32.mrb[20].mxu0 }
 0x17a   : > { %v524_v40 = vpop.f32.mrb[21].mxu0 }
 0x17b   : > { %v526_v41 = vpop.f32.mrb[22].mxu0 }
 0x17c   : > { %v1264_v42 = vpack.c.bf16 %v526_v41, %v522_v39  ;;  %v528_v43 = vpop.f32.mrb[23].mxu0 }
 0x17d   : > { %v1304_v44 = vpack.c.bf16 %v528_v43, %v524_v40 }
 0x17e   : > { %1360 = vst [vmem:[%s1938_s23 + $0x28] sm:$0xff] %v1264_v42  }
 0x17f   : > { %1367 = vst [vmem:[%s1941_s10 + $0x28] sm:$0xff] %v1304_v44  }
 0x181   : > { %v532_v45 = vpop.f32.mrb[24].mxu0 }
 0x182   : > { %v534_v46 = vpop.f32.mrb[25].mxu0 }
 0x183   : > { %v536_v47 = vpop.f32.mrb[26].mxu0 }
 0x184   : > { %v1269_v48 = vpack.c.bf16 %v536_v47, %v532_v45  ;;  %v538_v49 = vpop.f32.mrb[27].mxu0 }
 0x185   : > { %v1309_v50 = vpack.c.bf16 %v538_v49, %v534_v46 }
 0x186   : > { %1361 = vst [vmem:[%s1938_s23 + $0x30] sm:$0xff] %v1269_v48  }
 0x187   : > { %1368 = vst [vmem:[%s1941_s10 + $0x30] sm:$0xff] %v1309_v50  }
 0x189   : > { %v542_v51 = vpop.f32.mrb[28].mxu0 }
 0x18a   : > { %v544_v52 = vpop.f32.mrb[29].mxu0 }
 0x18b   : > { %v546_v53 = vpop.f32.mrb[30].mxu0 }
 0x18c   : > { %v1274_v54 = vpack.c.bf16 %v546_v53, %v542_v51  ;;  %v548_v55 = vpop.f32.mrb[31].mxu0 }
 0x18d   : > { %v1314_v56 = vpack.c.bf16 %v548_v55, %v544_v52 }
 0x18e   : > { %1362 = vst [vmem:[%s1938_s23 + $0x38] sm:$0xff] %v1274_v54  }
 0x18f   : > { %1369 = vst [vmem:[%s1941_s10 + $0x38] sm:$0xff] %v1314_v56  }
 0x190   : > { %1602 = shalt.err (!%p1599_p7)
}
 0x191   : > { %s1603_s23 = scalar_lea.hbm %s1978_s13, 1024  ;;  %s1607_s7 = scalar_lea.hbm %s2097_s2, 2048 }
 0x192   : > { %p1604_p9 = scmp.ne.s32.totalorder %s1978_s13, %s1603_s23  ;;  %p1608_p5 = scmp.lt.u32.totalorder %s1978_s13, %s2097_s2 }
 0x193   : > { %p1609_p11 = scmp.lt.u32.totalorder %s1607_s7, %s1603_s23  ;;  %p1611_p4 = scmp.lt.u32.totalorder %s1603_s23, %s1978_s13 }
 0x194   : > { %p1605_p2 = pnand %p1604_p9, %p1851_p12 }
 0x195   : > { %p1610_p1 = por %p1609_p11, %p1608_p5 }
 0x196   : > { %p1606_p0 = pneg %p1605_p2 }
 0x197   : > { %p1612_p6 = por %p1611_p4, %p1610_p1 }
 0x199   : > { %p1613_p8 = pnand %p1612_p6, %p1606_p0 }
 0x19b   : > { %1616 = shalt.err (!%p1613_p8)
}
 0x19c   : > { %s1729_s28 = smov 64   ;;  %s1730_s25 = smov 4  }
 0x19d   : > { %1431 = dma.vmem_to_hbm [thread:$0]  (%p1851_p12), %s1968_s29, 1024, %s1978_s13, %s889_s9, %s1729_s28, %s1729_s28, %s1730_s25  }
 0x19e   : > { %s2117_s12 = sand.u32 1, %s1779_s19   ;;  %s1617_s23 = scalar_lea.vmem %s1970_s11, 1024 }
 0x19f   : > { %s2023_s24 = scalar_lea.sflag [#allocation9], %s2117_s12  ;;  %p1618_p10 = scmp.ne.s32.totalorder %s1970_s11, %s1617_s23 }
 0x1a0   : > { %s1731_s10 = smov [#allocation8]  }
 0x1a1   : > { %p1619_p13 = pnand %p1618_p10, %p1851_p12  ;;  %s1621_s6 = sshll.u32 %s1731_s10, 4  ;;  %s1622_s6 = int_to_ptr.vmem [resolvable:$false] %s1621_s6 }
 0x1a2   : > { %s1623_s7 = scalar_lea.vmem %s1622_s6, 2048  ;;  %p1624_p7 = scmp.lt.s32.totalorder %s1970_s11, %s1622_s6 }
 0x1a3   : > { %p1620_p3 = pneg %p1619_p13  ;;  %p1625_p9 = scmp.lt.s32.totalorder %s1623_s7, %s1617_s23 }
 0x1a5   : > { %p1626_p2 = por %p1625_p9, %p1624_p7 }
 0x1a7   : > { %p1627_p0 = pnand %p1626_p2, %p1620_p3 }
 0x1a9   : > { %1630 = shalt.err (!%p1627_p0)
}
 0x1aa   : > { %s1631_s19 = scalar_lea.hbm %s1983_s8, 1024  ;;  %s1635_s9 = scalar_lea.hbm %s2098_s3, 2048 }
 0x1ab   : > { %p1632_p5 = scmp.ne.s32.totalorder %s1983_s8, %s1631_s19  ;;  %p1636_p4 = scmp.lt.u32.totalorder %s1983_s8, %s2098_s3 }
 0x1ac   : > { %p1637_p6 = scmp.lt.u32.totalorder %s1635_s9, %s1631_s19  ;;  %p1639_p10 = scmp.lt.u32.totalorder %s1631_s19, %s1983_s8 }
 0x1ad   : > { %p1633_p11 = pnand %p1632_p5, %p1851_p12 }
 0x1ae   : > { %p1638_p8 = por %p1637_p6, %p1636_p4 }
 0x1af   : > { %p1634_p1 = pneg %p1633_p11 }
 0x1b0   : > { %p1640_p13 = por %p1639_p10, %p1638_p8 }
 0x1b2   : > { %p1641_p3 = pnand %p1640_p13, %p1634_p1 }
 0x1b4   : > { %1644 = shalt.err (!%p1641_p3)
}
 0x1b5   : > { %1432 = dma.vmem_to_hbm [thread:$0]  (%p1851_p12), %s1970_s11, 1024, %s1983_s8, %s2023_s24, %s1729_s28, %s1729_s28, %s1730_s25  }
 0x1b6   : > { %s1645_s0 = scalar_lea.vmem %s1985_s26, 1024  ;;  %s1732_s12 = smov [#allocation10]  }
 0x1b7   : > { %p1646_p7 = scmp.ne.s32.totalorder %s1985_s26, %s1645_s0  ;;  %s1649_s23 = sshll.u32 %s1732_s12, 4  ;;  %s1650_s23 = int_to_ptr.vmem [resolvable:$false] %s1649_s23 }
 0x1b8   : > { %s1651_s10 = scalar_lea.vmem %s1650_s23, 2048  ;;  %p1652_p0 = scmp.lt.s32.totalorder %s1985_s26, %s1650_s23 }
 0x1b9   : > { %p1647_p9 = pnand %p1646_p7, %p1851_p12  ;;  %p1653_p5 = scmp.lt.s32.totalorder %s1651_s10, %s1645_s0 }
 0x1bb   : > { %p1648_p2 = pneg %p1647_p9  ;;  %p1654_p11 = por %p1653_p5, %p1652_p0 }
 0x1bd   : > { %p1655_p1 = pnand %p1654_p11, %p1648_p2 }
 0x1bf   : > { %1658 = shalt.err (!%p1655_p1)
}
 0x1c0   : > { %s1659_s11 = scalar_lea.hbm %s1991_s20, 1024  ;;  %s1663_s7 = scalar_lea.hbm %s2099_s4, 2048 }
 0x1c1   : > { %p1660_p4 = scmp.ne.s32.totalorder %s1991_s20, %s1659_s11  ;;  %p1664_p10 = scmp.lt.u32.totalorder %s1991_s20, %s2099_s4 }
 0x1c2   : > { %p1665_p13 = scmp.lt.u32.totalorder %s1663_s7, %s1659_s11  ;;  %p1667_p7 = scmp.lt.u32.totalorder %s1659_s11, %s1991_s20 }
 0x1c3   : > { %p1661_p6 = pnand %p1660_p4, %p1851_p12 }
 0x1c4   : > { %p1666_p3 = por %p1665_p13, %p1664_p10 }
 0x1c5   : > { %p1662_p8 = pneg %p1661_p6 }
 0x1c6   : > { %p1668_p9 = por %p1667_p7, %p1666_p3 }
 0x1c8   : > { %p1669_p2 = pnand %p1668_p9, %p1662_p8 }
 0x1ca   : > { %1672 = shalt.err (!%p1669_p2)
}
 0x1cb   : > { %1433 = dma.vmem_to_hbm [thread:$0]  (%p1851_p12), %s1985_s26, 1024, %s1991_s20, %s2023_s24, %s1729_s28, %s1729_s28, %s1730_s25  }
 0x1cc PF: > { %s959_s29 = sand.u32 1, %s1707_s15   ;;  %p2118_p0 = scmp.ne.s32.totalorder %s2106_s22, 0 }
 0x1cd   : > { %p2119_p5 = scmp.ge.s32.totalorder %s1719_s18, 2  ;;  %s960_s9 = scalar_lea.sflag [#allocation4], %s959_s29 }
 0x1cf   : > { %p1446_p11 = pnand %p2119_p5, %p2118_p0 }
 0x1d1   : > { %1698 = dma.done.wait (!%p1446_p11), %s960_s9, 1024  }
 0x1d2   : > { %1700 = vsyncadd (!%p1446_p11), %s960_s9, 4294966272  ;;  %s2120_s5 = sadd.s32 4294967294, %s1719_s18  }
 0x1d3   : > { %s968_s13 = sand.u32 1, %s2120_s5  }
 0x1d4   : > { %s969_s21 = scalar_lea.sflag [#allocation9], %s968_s13 }
 0x1d5   : > { %1702 = dma.done.wait (!%p1446_p11), %s969_s21, 2048  }
 0x1d6   : > { %1704 = vsyncadd (!%p1446_p11), %s969_s21, 4294965248  ;;  %p22_p12 = scmp.ge.s32.totalorder %s1816_s27, 4   ;;  %s2121_s15 = smov %s1711_s16 }
 0x1d7   : > { %s2122_s16 = smov %s1715_s17  ;;  %s2123_s17 = smov %s1847_s30 }
 0x1d8   : > { %s2124_s18 = smov %s1816_s27  ;;  %24 = sbr.rel (!%p22_p12) target bundleno = 10 (0xa), region = 109 }
 0x1df   :  { %983 = vsyncpa [#allocation3], 1 }
 0x1e0   :  { %985 = vsyncpa [#allocation3 + $0x1], 1 }
 0x1e1   :  { %986 = vsyncpa [#allocation6], 1 }
 0x1e2   :  { %987 = vsyncpa [#allocation4], 1 }
 0x1e3   :  { %989 = vsyncpa [#allocation4 + $0x1], 1 }
 0x1e4   :  { %990 = vsyncpa [#allocation9], 1 }
 0x1e5   :  { %992 = vsyncpa [#allocation9 + $0x1], 1 }

// kernel: tpu_custom_call.1
= control target key start
LH: loop header
LB: loop body
LE: loop exit
PB: predicated region body
PF: predicated region fallthrough
CT: control target
= control target key end

     0   :  { %s2095_s0 = inlined_call_operand.hbm [shape: f32[256,128], index: 0, kind: input, shape index: {}]   ;;  %s2096_s1 = inlined_call_operand.hbm [shape: bf16[128,384], index: 1, kind: input, shape index: {}]   ;;  %s2097_s2 = inlined_call_operand.hbm [shape: bf16[256,128], index: 2, kind: output, shape index: {0}]   ;;  %s2098_s3 = inlined_call_operand.hbm [shape: bf16[256,128], index: 3, kind: output, shape index: {1}]   ;;  %s2099_s4 = inlined_call_operand.hbm [shape: bf16[256,128], index: 4, kind: output, shape index: {2}]  }
   0x1   :  { %2104 = sst [smem:[#allocation15_spill]] %s2095_s0 }
   0x2   :  { %10 = vsyncpa [#allocation3], 0 }
   0x3   :  { %12 = vsyncpa [#allocation3 + $0x1], 0 }
   0x4   :  { %13 = vsyncpa [#allocation6], 0 }
   0x5   :  { %14 = vsyncpa [#allocation4], 0 }
   0x6   :  { %16 = vsyncpa [#allocation4 + $0x1], 0 }
   0x7   :  { %17 = vsyncpa [#allocation9], 0 }
   0x8   :  { %19 = vsyncpa [#allocation9 + $0x1], 0  ;;  %s1758_s15 = smov 0   ;;  %s1760_s16 = smov 0  }
   0x9   :  { %s1762_s17 = smov 0   ;;  %s1764_s18 = smov 0  }
   0xa LB: > { %s1779_s19 = sadd.s32 4294967295, %s1719_s18   ;;  %s2103_s20 = sadd.s32 4294967294, %s1719_s18   ;;  %s1719_s18 = sphi %s1764_s18, %s2124_s18   ;;  %s1715_s17 = sphi %s1762_s17, %s2123_s17   ;;  %s1711_s16 = sphi %s1760_s16, %s2122_s16   ;;  %s1707_s15 = sphi %s1758_s15, %s2121_s15  }
   0xb   : > { %p45_p0 = scmp.ne.s32.totalorder %s1711_s16, %s1707_s15  ;;  %p2100_p1 = scmp.eq.s32.totalorder %s1779_s19, 0 }
   0xc   : > { %p96_p3 = scmp.eq.s32.totalorder %s2103_s20, 1  ;;  %p1089_p5 = scmp.ge.s32.totalorder %s1719_s18, 1 }
   0xd   : > { %p1790_p4 = por %p2100_p1, %p45_p0  ;;  %p155_p7 = scmp.lt.s32.totalorder %s1719_s18, 3 }
   0xe   : > { %p1795_p6 = por %p96_p3, %p45_p0  ;;  %s1721_s24 = smov [#allocation5]  }
   0xf   : > { %s2105_s21 = scalar_select %p1790_p4, 1, 0 }
  0x10   : > { %s2106_s22 = scalar_select %p1795_p6, 1, 0 }
  0x11   : > { %p1800_p8 = pnand %p1089_p5, %p155_p7  ;;  %s167_s25 = sshll.u32 %s1721_s24, 4  ;;  %s1804_s25 = int_to_ptr.vmem [resolvable:$true] %s167_s25 }
  0x12   : > { %s1816_s27 = sadd.s32 1, %s1719_s18   ;;  %s32_s28 = sadd.s32 1, %s1715_s17 }
  0x13   : > { %s2107_s23 = scalar_select %p1800_p8, 1, 0 }
  0x14   : > { %p1437_p9 = pneg %p1800_p8  ;;  %s29_s29 = ssub.s32 %s1719_s18, %s1816_s27 }
  0x15   : > { %s1531_s6 = scalar_lea.hbm %s2096_s1, 3072 }
  0x16   : > { %p1811_p11 = pnand %p1437_p9, %p2100_p1  ;;  %p1532_p12 = scmp.ne.s32.totalorder %s2096_s1, %s1531_s6 }
  0x17   : > { %p1538_p5 = scmp.lt.u32.totalorder %s1531_s6, %s2096_s1 }
  0x18   : > { %p1533_p13 = pneg %p1811_p11 }
  0x1a   : > { %p1534_p0 = pnand %p1533_p13, %p1532_p12 }
  0x1c   : > { %p1535_p3 = pneg %p1534_p0 }
  0x1e   : > { %p1540_p7 = pnand %p1538_p5, %p1535_p3 }
  0x20   : > { %1543 = shalt.err (!%p1540_p7)
}
  0x21   : > { %s1544_s11 = scalar_lea.vmem %s1804_s25, 3072  ;;  %p1552_p2 = scmp.lt.s32.totalorder %s1804_s25, %s1804_s25 }
  0x22   : > { %p1545_p9 = scmp.ne.s32.totalorder %s1804_s25, %s1544_s11  ;;  %p1553_p6 = scmp.lt.s32.totalorder %s1544_s11, %s1544_s11 }
  0x24   : > { %p1547_p10 = pnand %p1545_p9, %p1533_p13  ;;  %p1554_p4 = por %p1553_p6, %p1552_p2 }
  0x26   : > { %p1548_p1 = pneg %p1547_p10 }
  0x28   : > { %p1555_p8 = pnand %p1554_p4, %p1548_p1 }
  0x2a   : > { %1558 = shalt.err (!%p1555_p8)
}
  0x2b   : > { %s1722_s12 = smov 192   ;;  %s1723_s13 = smov 12  }
  0x2c   : > { %1440 = dma.hbm_to_vmem [thread:$0]  (!%p1811_p11), %s2096_s1, 3072, %s1804_s25, [#allocation6], %s1722_s12, %s1722_s12, %s1723_s13  }
  0x2d   : > { %p30_p2 = scmp.eq.s32.totalorder %s29_s29, 0  ;;  %p39_p1 = scmp.ne.s32.totalorder %s1715_s17, %s1711_s16 }
  0x2e   : > { %p40_p4 = scmp.eq.s32.totalorder %s1719_s18, 0  ;;  %p1456_p6 = scmp.lt.s32.totalorder %s1719_s18, 2 }
  0x2f   : > { %s1847_s30 = scalar_select %p30_p2, %s1715_s17, %s32_s28  }
  0x30   : > { %p41_p8 = por %p40_p4, %p39_p1  ;;  %p2109_p10 = scmp.eq.s32.totalorder %s1779_s19, 1 }
  0x31   : > { %s181_s6 = sand.u32 1, %s1715_s17   ;;  %s1184_s7 = sshll.u32 %s1719_s18, 11 }
  0x32   : > { %p1851_p12 = por %p2109_p10, %p39_p1  ;;  %s1092_s8 = sshll.u32 %s181_s6, 7 }
  0x33   : > { %s2111_s0 = sld [smem:[#allocation15_spill]]  ;;  %s185_s25 = scalar_lea.vmem [#allocation2], %s1092_s8 }
  0x34   : > { %s192_s28 = sshll.u32 %s185_s25, 4  ;;  %p1862_p11 = pnand %p1456_p6, %p41_p8  ;;  %s1866_s28 = int_to_ptr.vmem [resolvable:$true] %s192_s28 }
  0x35   : > { %s1868_s11 = scalar_lea.sflag [#allocation3], %s181_s6 }
  0x36   : > { %p1561_p0 = pneg %p1862_p11 }
  0x39   : > { %s1860_s10 = scalar_lea.hbm %s2111_s0, %s1184_s7  ;;  %s1564_s24 = scalar_lea.hbm %s2111_s0, 4096 }
  0x3a   : > { %s1559_s12 = scalar_lea.hbm %s1860_s10, 2048  ;;  %p1565_p7 = scmp.lt.u32.totalorder %s1860_s10, %s2111_s0 }
  0x3b   : > { %p1560_p13 = scmp.ne.s32.totalorder %s1860_s10, %s1559_s12  ;;  %p1566_p9 = scmp.lt.u32.totalorder %s1564_s24, %s1559_s12 }
  0x3c   : > { %p1568_p1 = scmp.lt.u32.totalorder %s1559_s12, %s1860_s10 }
  0x3d   : > { %p1562_p3 = pnand %p1561_p0, %p1560_p13  ;;  %p1567_p2 = por %p1566_p9, %p1565_p7 }
  0x3f   : > { %p1563_p5 = pneg %p1562_p3  ;;  %p1569_p4 = por %p1568_p1, %p1567_p2 }
  0x41   : > { %p1570_p6 = pnand %p1569_p4, %p1563_p5 }
  0x43   : > { %1573 = shalt.err (!%p1570_p6)
}
  0x44   : > { %s1574_s6 = scalar_lea.vmem %s1866_s28, 2048  ;;  %s1724_s26 = smov [#allocation2]  }
  0x45   : > { %p1575_p8 = scmp.ne.s32.totalorder %s1866_s28, %s1574_s6  ;;  %s1579_s9 = sshll.u32 %s1724_s26, 4  ;;  %s1580_s9 = int_to_ptr.vmem [resolvable:$false] %s1579_s9 }
  0x46   : > { %s1581_s25 = scalar_lea.vmem %s1580_s9, 4096  ;;  %p1582_p3 = scmp.lt.s32.totalorder %s1866_s28, %s1580_s9 }
  0x47   : > { %p1577_p10 = pnand %p1575_p8, %p1561_p0  ;;  %p1583_p7 = scmp.lt.s32.totalorder %s1581_s25, %s1574_s6 }
  0x49   : > { %p1578_p13 = pneg %p1577_p10  ;;  %p1584_p9 = por %p1583_p7, %p1582_p3 }
  0x4b   : > { %p1585_p2 = pnand %p1584_p9, %p1578_p13 }
  0x4d   : > { %1588 = shalt.err (!%p1585_p2)
}
  0x4e   : > { %s1725_s12 = smov 128   ;;  %s1726_s13 = smov 8  }
  0x4f   : > { %1444 = dma.hbm_to_vmem [thread:$0]  (!%p1862_p11), %s1860_s10, 2048, %s1866_s28, %s1868_s11, %s1725_s12, %s1725_s12, %s1726_s13  }
  0x50   : > { %p2113_p0 = scmp.ne.s32.totalorder %s2107_s23, 0 }
  0x51   : > { %s1899_s14 = sand.u32 (!%p2113_p0), 1, %s1711_s16   ;;  %p2114_p5 = scmp.ne.s32.totalorder (!%p2113_p0), %s2105_s21, 0 }
  0x52   : > { %204 = sbr.rel (%p2113_p0) target bundleno = 460 (0x1cc), region = 28  ;;  %s1096_s24 = sshll.u32 (!%p2113_p0), %s1899_s14, 7 }
  0x53   : > { %s207_s7 = scalar_lea.sflag (!%p2113_p0), [#allocation3], %s1899_s14  ;;  %s1903_s8 = scalar_lea.vmem (!%p2113_p0), [#allocation2], %s1096_s24 }
  0x59   : > { %1690 = dma.done.wait (%p2114_p5), %s207_s7, 2048  }
  0x5a   : > { %1692 = vsyncadd (%p2114_p5), %s207_s7, 4294965248  ;;  %p2115_p11 = scmp.eq.s32.totalorder %s1779_s19, 0 }
  0x5c   : > { %1694 = dma.done.wait (%p2115_p11), [#allocation6], 3072   ;;  %p2116_p1 = pmov %p2115_p11 }
  0x5d   : > { %v1727_v0 = vmov 0   ;;  %v1499_v1 = vld [vmem:[#allocation5 + $0x4] ss:$12 sps:$4 sm:$0xff]   ;;  %v1501_v2 = vld [vmem:[#allocation5] ss:$12 sps:$4 sm:$0xff]   ;;  %v257_v28 = vld [vmem:[%s1903_s8 + $0x18] sm:$0xff] }
  0x5e   : > { %1696 = vsyncadd (%p2116_p1), [#allocation6], 4294964224  ;;  %470 = vmatprep.mubr.bf16.mxu0 %v1727_v0  ;;  %438 = vmatprep.subr.bf16.mxu0 %v1499_v1  ;;  %v1502_v3 = vld [vmem:[#allocation5 + $0x1c] ss:$12 sps:$4 sm:$0xff]   ;;  %v1504_v4 = vld [vmem:[#allocation5 + $0x18] ss:$12 sps:$4 sm:$0xff]  }
  0x5f   : > { %439 = vmatpush1.bf16.msra.mxu0 %v1501_v2  ;;  %v1505_v5 = vld [vmem:[#allocation5 + $0x34] ss:$12 sps:$4 sm:$0xff]   ;;  %v1507_v6 = vld [vmem:[#allocation5 + $0x30] ss:$12 sps:$4 sm:$0xff]   ;;  %v1508_v7 = vld [vmem:[#allocation5 + $0x4c] ss:$12 sps:$4 sm:$0xff]  }
  0x60   : > { %440 = vmatprep.subr.bf16.mxu0 %v1502_v3  ;;  %v1510_v8 = vld [vmem:[#allocation5 + $0x48] ss:$12 sps:$4 sm:$0xff]   ;;  %v1511_v9 = vld [vmem:[#allocation5 + $0x64] ss:$12 sps:$4 sm:$0xff]   ;;  %v1524_v13 = vld [vmem:[#allocation5 + $0x20] ss:$12 sps:$4 sm:$0xff]  }
  0x61   : > { %v1523_v10 = vld [vmem:[#allocation5 + $0x8] ss:$12 sps:$4 sm:$0xff]   ;;  %v254_v11 = vld [vmem:[%s1903_s8] sm:$0xff]  ;;  %v1526_v19 = vld [vmem:[#allocation5 + $0x50] ss:$12 sps:$4 sm:$0xff]   ;;  %s1098_s21 = sshll.u32 %s1899_s14, 6 }
  0x62   : > { %v255_v12 = vld [vmem:[%s1903_s8 + $0x8] sm:$0xff]  ;;  %1393 = vmatprep.subr.bf16.mxu1 %v1523_v10  ;;  %v1525_v16 = vld [vmem:[#allocation5 + $0x38] ss:$12 sps:$4 sm:$0xff]   ;;  %v1517_v20 = vld [vmem:[#allocation5 + $0x94] ss:$12 sps:$4 sm:$0xff]   ;;  %s1938_s23 = scalar_lea.vmem [#allocation7], %s1098_s21 }
  0x63   : > { %441 = vmatpush1.bf16.msra.mxu0 %v1504_v4  ;;  %v1513_v14 = vld [vmem:[#allocation5 + $0x60] ss:$12 sps:$4 sm:$0xff]   ;;  %1394 = vmatpush3.bf16.msra.mxu1 %v1523_v10  ;;  %v270_v15 = vpack.c.bf16 %v255_v12, %v254_v11  ;;  %v1514_v17 = vld [vmem:[#allocation5 + $0x7c] ss:$12 sps:$4 sm:$0xff]   ;;  %v1516_v18 = vld [vmem:[#allocation5 + $0x78] ss:$12 sps:$4 sm:$0xff]  }
  0x64   : > { %442 = vmatprep.subr.bf16.mxu0 %v1505_v5  ;;  %1395 = vmatprep.subr.bf16.mxu1 %v1524_v13  ;;  %v1519_v21 = vld [vmem:[#allocation5 + $0x90] ss:$12 sps:$4 sm:$0xff]   ;;  %v1527_v22 = vld [vmem:[#allocation5 + $0x68] ss:$12 sps:$4 sm:$0xff]   ;;  %v1520_v23 = vld [vmem:[#allocation5 + $0xac] ss:$12 sps:$4 sm:$0xff]  }
  0x65   : > { %1409 = vmatprep.mubr.bf16.mxu1 %v270_v15  ;;  %v1522_v24 = vld [vmem:[#allocation5 + $0xa8] ss:$12 sps:$4 sm:$0xff]   ;;  %v1528_v25 = vld [vmem:[#allocation5 + $0x80] ss:$12 sps:$4 sm:$0xff]   ;;  %v1529_v26 = vld [vmem:[#allocation5 + $0x98] ss:$12 sps:$4 sm:$0xff]  }
  0x66   : > { %v256_v27 = vld [vmem:[%s1903_s8 + $0x10] sm:$0xff]  ;;  %v258_v31 = vld [vmem:[%s1903_s8 + $0x20] sm:$0xff]  ;;  %v259_v32 = vld [vmem:[%s1903_s8 + $0x28] sm:$0xff]  ;;  %s1941_s10 = scalar_lea.vmem [#allocation8], %s1098_s21  ;;  %s1946_s28 = scalar_lea.vmem [#allocation10], %s1098_s21 }
  0x67   : > { %443 = vmatpush1.bf16.msra.mxu0 %v1507_v6  ;;  %1396 = vmatpush3.bf16.msra.mxu1 %v1524_v13  ;;  %v1530_v29 = vld [vmem:[#allocation5 + $0xb0] ss:$12 sps:$4 sm:$0xff]   ;;  %v271_v30 = vpack.c.bf16 %v257_v28, %v256_v27  ;;  %v272_v33 = vpack.c.bf16 %v259_v32, %v258_v31  ;;  %v262_v36 = vld [vmem:[%s1903_s8 + $0x40] sm:$0xff]  ;;  %v263_v37 = vld [vmem:[%s1903_s8 + $0x48] sm:$0xff]  ;;  %s912_s29 = sshll.u32 %s1938_s23, 4  ;;  %s928_s11 = sshll.u32 %s1941_s10, 4  ;;  %s1968_s29 = int_to_ptr.vmem [resolvable:$true] %s912_s29  ;;  %s1970_s11 = int_to_ptr.vmem [resolvable:$true] %s928_s11 }
  0x68   : > { %444 = vmatprep.subr.bf16.mxu0 %v1508_v7  ;;  %1397 = vmatprep.subr.bf16.mxu1 %v1525_v16  ;;  %v260_v34 = vld [vmem:[%s1903_s8 + $0x30] sm:$0xff]  ;;  %v261_v35 = vld [vmem:[%s1903_s8 + $0x38] sm:$0xff]  ;;  %v274_v39 = vpack.c.bf16 %v263_v37, %v262_v36  ;;  %v266_v42 = vld [vmem:[%s1903_s8 + $0x60] sm:$0xff]  ;;  %s1233_s6 = sshll.u32 %s1779_s19, 10  ;;  %s944_s26 = sshll.u32 %s1946_s28, 4  ;;  %s1985_s26 = int_to_ptr.vmem [resolvable:$true] %s944_s26 }
  0x69   : > { %v273_v38 = vpack.c.bf16 %v261_v35, %v260_v34  ;;  %v264_v40 = vld [vmem:[%s1903_s8 + $0x50] sm:$0xff]  ;;  %v265_v41 = vld [vmem:[%s1903_s8 + $0x58] sm:$0xff]  ;;  %v267_v43 = vld [vmem:[%s1903_s8 + $0x68] sm:$0xff]  ;;  %s1978_s13 = scalar_lea.hbm %s2097_s2, %s1233_s6  ;;  %s1991_s20 = scalar_lea.hbm %s2099_s4, %s1233_s6 }
  0x6a   : > { %v275_v44 = vpack.c.bf16 %v265_v41, %v264_v40  ;;  %v276_v45 = vpack.c.bf16 %v267_v43, %v266_v42  ;;  %v268_v46 = vld [vmem:[%s1903_s8 + $0x70] sm:$0xff]  ;;  %v269_v47 = vld [vmem:[%s1903_s8 + $0x78] sm:$0xff]  ;;  %s1983_s8 = scalar_lea.hbm %s2098_s3, %s1233_s6  ;;  %s889_s9 = scalar_lea.sflag [#allocation4], %s1899_s14 }
  0x6b   : > { %445 = vmatpush1.bf16.msra.mxu0 %v1510_v8  ;;  %1398 = vmatpush3.bf16.msra.mxu1 %v1525_v16  ;;  %v277_v48 = vpack.c.bf16 %v269_v47, %v268_v46  ;;  %s1589_s25 = scalar_lea.vmem %s1968_s29, 1024  ;;  %s1728_s12 = smov [#allocation7]  }
  0x6c   : > { %446 = vmatprep.subr.bf16.mxu0 %v1511_v9  ;;  %1399 = vmatprep.subr.bf16.mxu1 %v1526_v19  ;;  %p1590_p4 = scmp.ne.s32.totalorder %s1968_s29, %s1589_s25  ;;  %s1593_s0 = sshll.u32 %s1728_s12, 4  ;;  %s1594_s0 = int_to_ptr.vmem [resolvable:$false] %s1593_s0 }
  0x6d   : > { %s1595_s24 = scalar_lea.vmem %s1594_s0, 2048  ;;  %p1596_p10 = scmp.lt.s32.totalorder %s1968_s29, %s1594_s0 }
  0x6e   : > { %p1591_p6 = pnand %p1590_p4, %p1851_p12  ;;  %p1597_p13 = scmp.lt.s32.totalorder %s1595_s24, %s1589_s25 }
  0x6f   : > { %447 = vmatpush1.bf16.msra.mxu0 %v1513_v14  ;;  %1400 = vmatpush3.bf16.msra.mxu1 %v1526_v19 }
  0x70   : > { %448 = vmatprep.subr.bf16.mxu0 %v1514_v17  ;;  %1401 = vmatprep.subr.bf16.mxu1 %v1527_v22  ;;  %p1592_p8 = pneg %p1591_p6  ;;  %p1598_p3 = por %p1597_p13, %p1596_p10 }
  0x72   : > { %p1599_p7 = pnand %p1598_p3, %p1592_p8 }
  0x73   : > { %449 = vmatpush1.bf16.msra.mxu0 %v1516_v18  ;;  %1402 = vmatpush3.bf16.msra.mxu1 %v1527_v22 }
  0x74   : > { %450 = vmatprep.subr.bf16.mxu0 %v1517_v20  ;;  %1403 = vmatprep.subr.bf16.mxu1 %v1528_v25 }
  0x77   : > { %451 = vmatpush1.bf16.msra.mxu0 %v1519_v21  ;;  %1404 = vmatpush3.bf16.msra.mxu1 %v1528_v25 }
  0x78   : > { %452 = vmatprep.subr.bf16.mxu0 %v1520_v23  ;;  %1405 = vmatprep.subr.bf16.mxu1 %v1529_v26 }
  0x7b   : > { %453 = vmatpush1.bf16.msra.mxu0 %v1522_v24  ;;  %1406 = vmatpush3.bf16.msra.mxu1 %v1529_v26 }
  0x7c   : > { %1407 = vmatprep.subr.bf16.mxu1 %v1530_v29 }
  0x7e   : > { %471 = vmatmul.mubr.bf16.vlgmr.msra.gmra.mrb[0].mxu0 %v270_v15 }
  0x7f   : > { %480 = vmatprep.mubr.bf16.mxu0 %v1727_v0  ;;  %1408 = vmatpush3.bf16.msra.mxu1 %v1530_v29 }
  0x82   : > { %1410 = vmatmul.mubr.bf16.vlgmr.msra.gmra.mrb[0].mxu1 %v271_v30 }
  0x83   : > { %1413 = vmatprep.mubr.bf16.mxu1 %v272_v33 }
  0x86   : > { %481 = vmatmul.mubr.bf16.gmra.mrb[4].mxu0 %v271_v30 }
  0x87   : > { %490 = vmatprep.mubr.bf16.mxu0 %v1727_v0 }
  0x8a   : > { %1414 = vmatmul.mubr.bf16.gmra.mrb[4].mxu1 %v273_v38 }
  0x8b   : > { %1417 = vmatprep.mubr.bf16.mxu1 %v274_v39 }
  0x8e   : > { %491 = vmatmul.mubr.bf16.gmra.mrb[8].mxu0 %v272_v33 }
  0x8f   : > { %500 = vmatprep.mubr.bf16.mxu0 %v1727_v0 }
  0x92   : > { %1418 = vmatmul.mubr.bf16.gmra.mrb[8].mxu1 %v275_v44 }
  0x93   : > { %1421 = vmatprep.mubr.bf16.mxu1 %v276_v45 }
  0x96   : > { %501 = vmatmul.mubr.bf16.gmra.mrb[12].mxu0 %v273_v38 }
  0x97   : > { %510 = vmatprep.mubr.bf16.mxu0 %v1727_v0 }
  0x9a   : > { %1422 = vmatmul.mubr.bf16.gmra.mrb[12].mxu1 %v277_v48 }
  0x9e   : > { %511 = vmatmul.mubr.bf16.gmra.mrb[16].mxu0 %v274_v39 }
  0x9f   : > { %520 = vmatprep.mubr.bf16.mxu0 %v1727_v0 }
  0xa6   : > { %521 = vmatmul.mubr.bf16.gmra.mrb[20].mxu0 %v275_v44 }
  0xa7   : > { %530 = vmatprep.mubr.bf16.mxu0 %v1727_v0 }
  0xae   : > { %531 = vmatmul.mubr.bf16.gmra.mrb[24].mxu0 %v276_v45 }
  0xaf   : > { %540 = vmatprep.mubr.bf16.mxu0 %v1727_v0 }
  0xb6   : > { %541 = vmatmul.mubr.bf16.gmra.mrb[28].mxu0 %v277_v48 }
 0x151   : > { %v472_v49 = vpop.f32.mrb[0].mxu0 }
 0x152   : > { %v474_v50 = vpop.f32.mrb[1].mxu0 }
 0x153   : > { %v476_v51 = vpop.f32.mrb[2].mxu0 }
 0x154   : > { %v1239_v52 = vpack.c.bf16 %v476_v51, %v472_v49  ;;  %v478_v53 = vpop.f32.mrb[3].mxu0 }
 0x155   : > { %v1279_v54 = vpack.c.bf16 %v478_v53, %v474_v50  ;;  %v1411_v60 = vpop.f32.mrb[0].mxu1 }
 0x156   : > { %1240 = vst [vmem:[%s1938_s23] sm:$0xff] %v1239_v52   ;;  %v585_v62 = vpop.f32.mrb[1].mxu1 }
 0x157   : > { %1280 = vst [vmem:[%s1941_s10] sm:$0xff] %v1279_v54   ;;  %v1412_v63 = vpop.f32.mrb[2].mxu1 }
 0x158   : > { %v1324_v0 = vpack.c.bf16 %v1412_v63, %v1411_v60  ;;  %v588_v1 = vpop.f32.mrb[3].mxu1 }
 0x159   : > { %v482_v55 = vpop.f32.mrb[4].mxu0  ;;  %v1319_v2 = vpack.c.bf16 %v588_v1, %v585_v62 }
 0x15a   : > { %v484_v56 = vpop.f32.mrb[5].mxu0  ;;  %1370 = vst [vmem:[%s1946_s28 + $0x8] sm:$0xff] %v1324_v0  }
 0x15b   : > { %v486_v57 = vpop.f32.mrb[6].mxu0  ;;  %1320 = vst [vmem:[%s1946_s28] sm:$0xff] %v1319_v2  }
 0x15c   : > { %v1244_v58 = vpack.c.bf16 %v486_v57, %v482_v55  ;;  %v488_v59 = vpop.f32.mrb[7].mxu0 }
 0x15d   : > { %v1284_v61 = vpack.c.bf16 %v488_v59, %v484_v56  ;;  %v1415_v8 = vpop.f32.mrb[4].mxu1 }
 0x15e   : > { %1356 = vst [vmem:[%s1938_s23 + $0x8] sm:$0xff] %v1244_v58   ;;  %v601_v10 = vpop.f32.mrb[5].mxu1 }
 0x15f   : > { %1363 = vst [vmem:[%s1941_s10 + $0x8] sm:$0xff] %v1284_v61   ;;  %v1416_v11 = vpop.f32.mrb[6].mxu1 }
 0x160   : > { %v1334_v12 = vpack.c.bf16 %v1416_v11, %v1415_v8  ;;  %v604_v13 = vpop.f32.mrb[7].mxu1 }
 0x161   : > { %v492_v3 = vpop.f32.mrb[8].mxu0  ;;  %v1329_v14 = vpack.c.bf16 %v604_v13, %v601_v10 }
 0x162   : > { %v494_v4 = vpop.f32.mrb[9].mxu0  ;;  %1372 = vst [vmem:[%s1946_s28 + $0x18] sm:$0xff] %v1334_v12  }
 0x163   : > { %v496_v5 = vpop.f32.mrb[10].mxu0  ;;  %1371 = vst [vmem:[%s1946_s28 + $0x10] sm:$0xff] %v1329_v14  }
 0x164   : > { %v1249_v6 = vpack.c.bf16 %v496_v5, %v492_v3  ;;  %v498_v7 = vpop.f32.mrb[11].mxu0 }
 0x165   : > { %v1289_v9 = vpack.c.bf16 %v498_v7, %v494_v4  ;;  %v1419_v20 = vpop.f32.mrb[8].mxu1 }
 0x166   : > { %1357 = vst [vmem:[%s1938_s23 + $0x10] sm:$0xff] %v1249_v6   ;;  %v617_v22 = vpop.f32.mrb[9].mxu1 }
 0x167   : > { %1364 = vst [vmem:[%s1941_s10 + $0x10] sm:$0xff] %v1289_v9   ;;  %v1420_v23 = vpop.f32.mrb[10].mxu1 }
 0x168   : > { %v1344_v24 = vpack.c.bf16 %v1420_v23, %v1419_v20  ;;  %v620_v25 = vpop.f32.mrb[11].mxu1 }
 0x169   : > { %v502_v15 = vpop.f32.mrb[12].mxu0  ;;  %v1339_v26 = vpack.c.bf16 %v620_v25, %v617_v22 }
 0x16a   : > { %v504_v16 = vpop.f32.mrb[13].mxu0  ;;  %1374 = vst [vmem:[%s1946_s28 + $0x28] sm:$0xff] %v1344_v24  }
 0x16b   : > { %v506_v17 = vpop.f32.mrb[14].mxu0  ;;  %1373 = vst [vmem:[%s1946_s28 + $0x20] sm:$0xff] %v1339_v26  }
 0x16c   : > { %v1254_v18 = vpack.c.bf16 %v506_v17, %v502_v15  ;;  %v508_v19 = vpop.f32.mrb[15].mxu0 }
 0x16d   : > { %v1294_v21 = vpack.c.bf16 %v508_v19, %v504_v16  ;;  %v1423_v32 = vpop.f32.mrb[12].mxu1 }
 0x16e   : > { %1358 = vst [vmem:[%s1938_s23 + $0x18] sm:$0xff] %v1254_v18   ;;  %v633_v34 = vpop.f32.mrb[13].mxu1 }
 0x16f   : > { %1365 = vst [vmem:[%s1941_s10 + $0x18] sm:$0xff] %v1294_v21   ;;  %v1424_v35 = vpop.f32.mrb[14].mxu1 }
 0x170   : > { %v1354_v36 = vpack.c.bf16 %v1424_v35, %v1423_v32  ;;  %v636_v37 = vpop.f32.mrb[15].mxu1 }
 0x171   : > { %v512_v27 = vpop.f32.mrb[16].mxu0  ;;  %v1349_v38 = vpack.c.bf16 %v636_v37, %v633_v34 }
 0x172   : > { %v514_v28 = vpop.f32.mrb[17].mxu0  ;;  %1376 = vst [vmem:[%s1946_s28 + $0x38] sm:$0xff] %v1354_v36  }
 0x173   : > { %v516_v29 = vpop.f32.mrb[18].mxu0  ;;  %1375 = vst [vmem:[%s1946_s28 + $0x30] sm:$0xff] %v1349_v38  }
 0x174   : > { %v1259_v30 = vpack.c.bf16 %v516_v29, %v512_v27  ;;  %v518_v31 = vpop.f32.mrb[19].mxu0 }
 0x175   : > { %v1299_v33 = vpack.c.bf16 %v518_v31, %v514_v28 }
 0x176   : > { %1359 = vst [vmem:[%s1938_s23 + $0x20] sm:$0xff] %v1259_v30  }
 0x177   : > { %1366 = vst [vmem:[%s1941_s10 + $0x20] sm:$0xff] %v1299_v33  }
 0x179   : > { %v522_v39 = vpop.f32.mrb[20].mxu0 }
 0x17a   : > { %v524_v40 = vpop.f32.mrb[21].mxu0 }
 0x17b   : > { %v526_v41 = vpop.f32.mrb[22].mxu0 }
 0x17c   : > { %v1264_v42 = vpack.c.bf16 %v526_v41, %v522_v39  ;;  %v528_v43 = vpop.f32.mrb[23].mxu0 }
 0x17d   : > { %v1304_v44 = vpack.c.bf16 %v528_v43, %v524_v40 }
 0x17e   : > { %1360 = vst [vmem:[%s1938_s23 + $0x28] sm:$0xff] %v1264_v42  }
 0x17f   : > { %1367 = vst [vmem:[%s1941_s10 + $0x28] sm:$0xff] %v1304_v44  }
 0x181   : > { %v532_v45 = vpop.f32.mrb[24].mxu0 }
 0x182   : > { %v534_v46 = vpop.f32.mrb[25].mxu0 }
 0x183   : > { %v536_v47 = vpop.f32.mrb[26].mxu0 }
 0x184   : > { %v1269_v48 = vpack.c.bf16 %v536_v47, %v532_v45  ;;  %v538_v49 = vpop.f32.mrb[27].mxu0 }
 0x185   : > { %v1309_v50 = vpack.c.bf16 %v538_v49, %v534_v46 }
 0x186   : > { %1361 = vst [vmem:[%s1938_s23 + $0x30] sm:$0xff] %v1269_v48  }
 0x187   : > { %1368 = vst [vmem:[%s1941_s10 + $0x30] sm:$0xff] %v1309_v50  }
 0x189   : > { %v542_v51 = vpop.f32.mrb[28].mxu0 }
 0x18a   : > { %v544_v52 = vpop.f32.mrb[29].mxu0 }
 0x18b   : > { %v546_v53 = vpop.f32.mrb[30].mxu0 }
 0x18c   : > { %v1274_v54 = vpack.c.bf16 %v546_v53, %v542_v51  ;;  %v548_v55 = vpop.f32.mrb[31].mxu0 }
 0x18d   : > { %v1314_v56 = vpack.c.bf16 %v548_v55, %v544_v52 }
 0x18e   : > { %1362 = vst [vmem:[%s1938_s23 + $0x38] sm:$0xff] %v1274_v54  }
 0x18f   : > { %1369 = vst [vmem:[%s1941_s10 + $0x38] sm:$0xff] %v1314_v56  }
 0x190   : > { %1602 = shalt.err (!%p1599_p7)
}
 0x191   : > { %s1603_s23 = scalar_lea.hbm %s1978_s13, 1024  ;;  %s1607_s7 = scalar_lea.hbm %s2097_s2, 2048 }
 0x192   : > { %p1604_p9 = scmp.ne.s32.totalorder %s1978_s13, %s1603_s23  ;;  %p1608_p5 = scmp.lt.u32.totalorder %s1978_s13, %s2097_s2 }
 0x193   : > { %p1609_p11 = scmp.lt.u32.totalorder %s1607_s7, %s1603_s23  ;;  %p1611_p4 = scmp.lt.u32.totalorder %s1603_s23, %s1978_s13 }
 0x194   : > { %p1605_p2 = pnand %p1604_p9, %p1851_p12 }
 0x195   : > { %p1610_p1 = por %p1609_p11, %p1608_p5 }
 0x196   : > { %p1606_p0 = pneg %p1605_p2 }
 0x197   : > { %p1612_p6 = por %p1611_p4, %p1610_p1 }
 0x199   : > { %p1613_p8 = pnand %p1612_p6, %p1606_p0 }
 0x19b   : > { %1616 = shalt.err (!%p1613_p8)
}
 0x19c   : > { %s1729_s28 = smov 64   ;;  %s1730_s25 = smov 4  }
 0x19d   : > { %1431 = dma.vmem_to_hbm [thread:$0]  (%p1851_p12), %s1968_s29, 1024, %s1978_s13, %s889_s9, %s1729_s28, %s1729_s28, %s1730_s25  }
 0x19e   : > { %s2117_s12 = sand.u32 1, %s1779_s19   ;;  %s1617_s23 = scalar_lea.vmem %s1970_s11, 1024 }
 0x19f   : > { %s2023_s24 = scalar_lea.sflag [#allocation9], %s2117_s12  ;;  %p1618_p10 = scmp.ne.s32.totalorder %s1970_s11, %s1617_s23 }
 0x1a0   : > { %s1731_s10 = smov [#allocation8]  }
 0x1a1   : > { %p1619_p13 = pnand %p1618_p10, %p1851_p12  ;;  %s1621_s6 = sshll.u32 %s1731_s10, 4  ;;  %s1622_s6 = int_to_ptr.vmem [resolvable:$false] %s1621_s6 }
 0x1a2   : > { %s1623_s7 = scalar_lea.vmem %s1622_s6, 2048  ;;  %p1624_p7 = scmp.lt.s32.totalorder %s1970_s11, %s1622_s6 }
 0x1a3   : > { %p1620_p3 = pneg %p1619_p13  ;;  %p1625_p9 = scmp.lt.s32.totalorder %s1623_s7, %s1617_s23 }
 0x1a5   : > { %p1626_p2 = por %p1625_p9, %p1624_p7 }
 0x1a7   : > { %p1627_p0 = pnand %p1626_p2, %p1620_p3 }
 0x1a9   : > { %1630 = shalt.err (!%p1627_p0)
}
 0x1aa   : > { %s1631_s19 = scalar_lea.hbm %s1983_s8, 1024  ;;  %s1635_s9 = scalar_lea.hbm %s2098_s3, 2048 }
 0x1ab   : > { %p1632_p5 = scmp.ne.s32.totalorder %s1983_s8, %s1631_s19  ;;  %p1636_p4 = scmp.lt.u32.totalorder %s1983_s8, %s2098_s3 }
 0x1ac   : > { %p1637_p6 = scmp.lt.u32.totalorder %s1635_s9, %s1631_s19  ;;  %p1639_p10 = scmp.lt.u32.totalorder %s1631_s19, %s1983_s8 }
 0x1ad   : > { %p1633_p11 = pnand %p1632_p5, %p1851_p12 }
 0x1ae   : > { %p1638_p8 = por %p1637_p6, %p1636_p4 }
 0x1af   : > { %p1634_p1 = pneg %p1633_p11 }
 0x1b0   : > { %p1640_p13 = por %p1639_p10, %p1638_p8 }
 0x1b2   : > { %p1641_p3 = pnand %p1640_p13, %p1634_p1 }
 0x1b4   : > { %1644 = shalt.err (!%p1641_p3)
}
 0x1b5   : > { %1432 = dma.vmem_to_hbm [thread:$0]  (%p1851_p12), %s1970_s11, 1024, %s1983_s8, %s2023_s24, %s1729_s28, %s1729_s28, %s1730_s25  }
 0x1b6   : > { %s1645_s0 = scalar_lea.vmem %s1985_s26, 1024  ;;  %s1732_s12 = smov [#allocation10]  }
 0x1b7   : > { %p1646_p7 = scmp.ne.s32.totalorder %s1985_s26, %s1645_s0  ;;  %s1649_s23 = sshll.u32 %s1732_s12, 4  ;;  %s1650_s23 = int_to_ptr.vmem [resolvable:$false] %s1649_s23 }
 0x1b8   : > { %s1651_s10 = scalar_lea.vmem %s1650_s23, 2048  ;;  %p1652_p0 = scmp.lt.s32.totalorder %s1985_s26, %s1650_s23 }
 0x1b9   : > { %p1647_p9 = pnand %p1646_p7, %p1851_p12  ;;  %p1653_p5 = scmp.lt.s32.totalorder %s1651_s10, %s1645_s0 }
 0x1bb   : > { %p1648_p2 = pneg %p1647_p9  ;;  %p1654_p11 = por %p1653_p5, %p1652_p0 }
 0x1bd   : > { %p1655_p1 = pnand %p1654_p11, %p1648_p2 }
 0x1bf   : > { %1658 = shalt.err (!%p1655_p1)
}
 0x1c0   : > { %s1659_s11 = scalar_lea.hbm %s1991_s20, 1024  ;;  %s1663_s7 = scalar_lea.hbm %s2099_s4, 2048 }
 0x1c1   : > { %p1660_p4 = scmp.ne.s32.totalorder %s1991_s20, %s1659_s11  ;;  %p1664_p10 = scmp.lt.u32.totalorder %s1991_s20, %s2099_s4 }
 0x1c2   : > { %p1665_p13 = scmp.lt.u32.totalorder %s1663_s7, %s1659_s11  ;;  %p1667_p7 = scmp.lt.u32.totalorder %s1659_s11, %s1991_s20 }
 0x1c3   : > { %p1661_p6 = pnand %p1660_p4, %p1851_p12 }
 0x1c4   : > { %p1666_p3 = por %p1665_p13, %p1664_p10 }
 0x1c5   : > { %p1662_p8 = pneg %p1661_p6 }
 0x1c6   : > { %p1668_p9 = por %p1667_p7, %p1666_p3 }
 0x1c8   : > { %p1669_p2 = pnand %p1668_p9, %p1662_p8 }
 0x1ca   : > { %1672 = shalt.err (!%p1669_p2)
}
 0x1cb   : > { %1433 = dma.vmem_to_hbm [thread:$0]  (%p1851_p12), %s1985_s26, 1024, %s1991_s20, %s2023_s24, %s1729_s28, %s1729_s28, %s1730_s25  }
 0x1cc PF: > { %s959_s29 = sand.u32 1, %s1707_s15   ;;  %p2118_p0 = scmp.ne.s32.totalorder %s2106_s22, 0 }
 0x1cd   : > { %p2119_p5 = scmp.ge.s32.totalorder %s1719_s18, 2  ;;  %s960_s9 = scalar_lea.sflag [#allocation4], %s959_s29 }
 0x1cf   : > { %p1446_p11 = pnand %p2119_p5, %p2118_p0 }
 0x1d1   : > { %1698 = dma.done.wait (!%p1446_p11), %s960_s9, 1024  }
 0x1d2   : > { %1700 = vsyncadd (!%p1446_p11), %s960_s9, 4294966272  ;;  %s2120_s5 = sadd.s32 4294967294, %s1719_s18  }
 0x1d3   : > { %s968_s13 = sand.u32 1, %s2120_s5  }
 0x1d4   : > { %s969_s21 = scalar_lea.sflag [#allocation9], %s968_s13 }
 0x1d5   : > { %1702 = dma.done.wait (!%p1446_p11), %s969_s21, 2048  }
 0x1d6   : > { %1704 = vsyncadd (!%p1446_p11), %s969_s21, 4294965248  ;;  %p22_p12 = scmp.ge.s32.totalorder %s1816_s27, 4   ;;  %s2121_s15 = smov %s1711_s16 }
 0x1d7   : > { %s2122_s16 = smov %s1715_s17  ;;  %s2123_s17 = smov %s1847_s30 }
 0x1d8   : > { %s2124_s18 = smov %s1816_s27  ;;  %24 = sbr.rel (!%p22_p12) target bundleno = 10 (0xa), region = 109 }
 0x1df   :  { %983 = vsyncpa [#allocation3], 1 }
 0x1e0   :  { %985 = vsyncpa [#allocation3 + $0x1], 1 }
 0x1e1   :  { %986 = vsyncpa [#allocation6], 1 }
 0x1e2   :  { %987 = vsyncpa [#allocation4], 1 }
 0x1e3   :  { %989 = vsyncpa [#allocation4 + $0x1], 1 }
 0x1e4   :  { %990 = vsyncpa [#allocation9], 1 }
 0x1e5   :  { %992 = vsyncpa [#allocation9 + $0x1], 1 }

</bundles_post_ra>
